<compile_context>
chip_gen: v7x
topology: tpu7x:2x2x1
jax: 0.10.0
libtpu: 0.0.40
codegen_flags: <defaults>
</compile_context>

<pallas_src>
import functools
import math

import jax
import jax.numpy as jnp
from jax.experimental import pallas as pl
from jax.experimental.pallas import tpu as pltpu


def _round_up(x, m):
    return (x + m - 1) // m * m


# ----------------------------------------------------------------------------
# Pallas kernel: whole block for `block_b` batch elements, tiled over the KV axis
# Grid: (grid_b, n_kv)  -- kv (reduction) axis last, marked "arbitrary".
# ----------------------------------------------------------------------------
def attention_block_kernel(
    x_ref, xkv_ref, mask_ref,
    wq_ref, bq_ref,
    wkv_ref, bkv_ref,
    wo_ref, bo_ref,
    g1_ref, beta1_ref,
    wl_ref, bl_ref,
    g2_ref, beta2_ref,
    o_ref,
    q_scr, m_scr, l_scr, acc_scr,
    *, num_heads: int, head_dim: int, linear_dim: int,
):
    Bb, S, E = x_ref.shape
    H, D = num_heads, head_dim
    M = Bb * S                       # query rows in this batch-block
    Tk = xkv_ref.shape[1]            # KV tile length
    Mk = Bb * Tk
    Lp = wl_ref.shape[1]             # lane-padded linear dim (multiple of 128)
    L = linear_dim

    kv = pl.program_id(1)
    n_kv = pl.num_programs(1)

    def to_heads(t, rows):
        # (Bb*rows, E) -> (H, Bb*rows, D) -> (H*Bb, rows, D); batch index n = h*Bb + b
        t = pltpu.einshape("mhd->hmd", t.reshape(Bb * rows, H, D))
        return t.reshape(H * Bb, rows, D)

    # --- once per batch-block: Q projection (scale pre-folded into wq/bq) + softmax state ---
    @pl.when(kv == 0)
    def _():
        xq = x_ref[...].astype(jnp.bfloat16).reshape(M, E)
        q = jnp.dot(xq, wq_ref[...], preferred_element_type=jnp.float32) + bq_ref[...]
        q_scr[...] = to_heads(q, S).astype(jnp.bfloat16)
        m_scr[...] = jnp.full_like(m_scr, -jnp.inf)
        l_scr[...] = jnp.zeros_like(l_scr)
        acc_scr[...] = jnp.zeros_like(acc_scr)

    # --- every kv step: fused K/V projection for this tile + online-softmax update ---
    xkv = xkv_ref[...].astype(jnp.bfloat16).reshape(Mk, E)
    kvp = jnp.dot(xkv, wkv_ref[...], preferred_element_type=jnp.float32) + bkv_ref[...]
    kh = to_heads(kvp[:, :E], Tk).astype(jnp.bfloat16)
    vh = to_heads(kvp[:, E:], Tk).astype(jnp.bfloat16)

    mask = mask_ref[...].astype(jnp.float32)             # (S, Tk), additive, all heads/batches
    s = jnp.einsum("nqd,nkd->nqk", q_scr[...], kh,
                   preferred_element_type=jnp.float32) + mask
    m_prev = m_scr[...]
    m_new = jnp.maximum(m_prev, jnp.max(s, axis=-1, keepdims=True))
    alpha = jnp.exp(m_prev - m_new)
    p = jnp.exp(s - m_new)
    l_scr[...] = alpha * l_scr[...] + jnp.sum(p, axis=-1, keepdims=True)
    acc_scr[...] = alpha * acc_scr[...] + jnp.einsum(
        "nqk,nkd->nqd", p.astype(jnp.bfloat16), vh, preferred_element_type=jnp.float32)
    m_scr[...] = m_new

    # --- once per batch-block: out-proj + residual + LN1 + Linear + ReLU + LN2 ---
    @pl.when(kv == n_kv - 1)
    def _():
        o = acc_scr[...] / l_scr[...]                    # exact softmax normalization (f32)
        # back to (M, E), heads contiguous along lanes (torch head layout)
        o = pltpu.einshape("hmd->mhd", o.reshape(H, M, D)).reshape(M, E)

        attn = jnp.dot(o.astype(jnp.bfloat16), wo_ref[...],
                       preferred_element_type=jnp.float32) + bo_ref[...]
        x32 = x_ref[...].astype(jnp.float32).reshape(M, E)
        h1 = x32 + attn
        mu1 = jnp.mean(h1, axis=-1, keepdims=True)
        var1 = jnp.mean((h1 - mu1) ** 2, axis=-1, keepdims=True)
        h1n = (h1 - mu1) * jax.lax.rsqrt(var1 + 1e-5) * g1_ref[...] + beta1_ref[...]

        # Linear -> ReLU (lane-padded to Lp; padded weight/bias columns are zero)
        z = jnp.dot(h1n.astype(jnp.bfloat16), wl_ref[...],
                    preferred_element_type=jnp.float32) + bl_ref[...]
        z = jnp.maximum(z, 0.0)                          # padded lanes are exactly 0

        # LayerNorm2 over the real L lanes only
        mu2 = jnp.sum(z, axis=-1, keepdims=True) * (1.0 / L)   # pads contribute 0
        zc = z - mu2
        if Lp != L:
            lane = jax.lax.broadcasted_iota(jnp.int32, (1, Lp), 1)
            zc = jnp.where(lane < L, zc, 0.0)
        var2 = jnp.sum(zc * zc, axis=-1, keepdims=True) * (1.0 / L)
        out = zc * jax.lax.rsqrt(var2 + 1e-5) * g2_ref[...] + beta2_ref[...]

        o_ref[...] = out.reshape(Bb, S, Lp).astype(o_ref.dtype)


# ----------------------------------------------------------------------------
# One-time parameter preparation (fold scale, fuse K/V weights, pad, cast)
# ----------------------------------------------------------------------------
def prepare_params(params, *, num_heads: int):
    E = params["wq"].shape[0]
    L = params["wl"].shape[1]
    D = E // num_heads
    scale = 1.0 / math.sqrt(D)
    Lp = _round_up(L, 128)
    pad = Lp - L
    bf16, f32 = jnp.bfloat16, jnp.float32
    return {
        "wq": (params["wq"] * scale).astype(bf16),       # 1/sqrt(D) folded into q-proj
        "bq": (params["bq"] * scale).astype(f32),
        "wkv": jnp.concatenate([params["wk"], params["wv"]], axis=1).astype(bf16),
        "bkv": jnp.concatenate([params["bk"], params["bv"]], axis=1).astype(f32),
        "wo": params["wo"].astype(bf16),
        "bo": params["bo"].astype(f32),
        "g1": params["g1"].astype(f32),
        "beta1": params["beta1"].astype(f32),
        "wl": jnp.pad(params["wl"], ((0, 0), (0, pad))).astype(bf16),
        "bl": jnp.pad(params["bl"], ((0, 0), (0, pad))).astype(f32),
        "g2": jnp.pad(params["g2"], ((0, 0), (0, pad))).astype(f32),
        "beta2": jnp.pad(params["beta2"], ((0, 0), (0, pad))).astype(f32),
    }


def _vmem_limit_bytes():
    # Per-chip scoped VMEM limit with headroom below physical capacity:
    # v7x 64 MiB -> ~56 MiB, v5e/v6e 128 MiB -> 112 MiB.
    try:
        info = pltpu.get_tpu_info()
        cap = getattr(info, "vmem_capacity_bytes", None) or (64 << 20)
    except Exception:
        cap = 64 << 20
    return int(min(cap * 7 // 8, 112 << 20))


def _const_spec(shape):
    # Grid-constant operand: fetched once; single-buffer it to avoid wasting VMEM
    # on a second (never used) pipeline buffer.
    zeros = (0,) * len(shape)
    idx = lambda b, k: zeros
    try:
        return pl.BlockSpec(shape, idx, pipeline_mode=pl.Buffered(1))
    except Exception:   # older API without pipeline_mode: fall back to default buffering
        return pl.BlockSpec(shape, idx)


# ----------------------------------------------------------------------------
# Wrapper
# ----------------------------------------------------------------------------
def attention_block(x, attn_mask, prepped, *, num_heads: int, linear_dim: int,
                    block_b: int = None, tile_k: int = None):
    """x: (B, S, E) float32, attn_mask: (S, S) additive float mask."""
    B, S, E = x.shape
    L = linear_dim
    head_dim = E // num_heads
    Lp = prepped["wl"].shape[1]

    # --- batch blocking: keep grid_b >= 2 (v7x has 2 TensorCores; also enables
    # x/out DMA to pipeline under compute), prefer M = block_b*S multiple of 256.
    if block_b is None:
        candidates = [d for d in range(1, B + 1)
                      if B % d == 0 and (B // d >= 2 or B == 1) and d * S <= 512]
        if not candidates:
            candidates = [1]
        aligned = [d for d in candidates if (d * S) % 256 == 0]
        block_b = max(aligned) if aligned else max(candidates)
    assert B % block_b == 0, "block_b must divide batch"
    grid_b = B // block_b

    # --- KV tiling: cap the per-step score tensor at O(S * tile_k) ---
    if tile_k is None:
        tile_k = S
        if S > 1024:
            for t in (1024, 512, 256, 128):
                if S % t == 0:
                    tile_k = t
                    break
    assert S % tile_k == 0, "tile_k must divide sequence length"
    n_kv = S // tile_k

    kernel = functools.partial(
        attention_block_kernel,
        num_heads=num_heads, head_dim=head_dim, linear_dim=L,
    )

    N = num_heads * block_b
    in_specs = [
        pl.BlockSpec((block_b, S, E), lambda b, k: (b, 0, 0)),        # x (queries / residual)
        pl.BlockSpec((block_b, tile_k, E), lambda b, k: (b, k, 0)),   # x (KV tile)
        pl.BlockSpec((S, tile_k), lambda b, k: (0, k)),               # attn_mask tile
        _const_spec((E, E)), _const_spec((1, E)),                     # wq, bq (pre-scaled)
        _const_spec((E, 2 * E)), _const_spec((1, 2 * E)),             # wkv, bkv (fused)
        _const_spec((E, E)), _const_spec((1, E)),                     # wo, bo
        _const_spec((1, E)), _const_spec((1, E)),                     # norm1 gamma/beta
        _const_spec((E, Lp)), _const_spec((1, Lp)),                   # wl, bl (lane-padded)
        _const_spec((1, Lp)), _const_spec((1, Lp)),                   # norm2 gamma/beta (padded)
    ]

    out_padded = pl.pallas_call(
        kernel,
        out_shape=jax.ShapeDtypeStruct((B, S, Lp), x.dtype),
        grid_spec=pltpu.PrefetchScalarGridSpec(
            num_scalar_prefetch=0,
            grid=(grid_b, n_kv),
            in_specs=in_specs,
            out_specs=pl.BlockSpec((block_b, S, Lp), lambda b, k: (b, 0, 0)),
            scratch_shapes=[
                pltpu.VMEM((N, S, head_dim), jnp.bfloat16),   # Q heads (computed at kv==0)
                pltpu.VMEM((N, S, 1), jnp.float32),           # running max m
                pltpu.VMEM((N, S, 1), jnp.float32),           # running denom l
                pltpu.VMEM((N, S, head_dim), jnp.float32),    # running acc
            ],
        ),
        compiler_params=pltpu.CompilerParams(
            dimension_semantics=("parallel", "arbitrary"),
            vmem_limit_bytes=_vmem_limit_bytes(),
        ),
    )(
        x, x, attn_mask,
        prepped["wq"], prepped["bq"],
        prepped["wkv"], prepped["bkv"],
        prepped["wo"], prepped["bo"],
        prepped["g1"], prepped["beta1"],
        prepped["wl"], prepped["bl"],
        prepped["g2"], prepped["beta2"],
    )
    # Skip the extra HBM round trip entirely when L is already lane-aligned.
    return out_padded if Lp == L else out_padded[..., :L]


# ----------------------------------------------------------------------------
# Pure-JAX f32 reference (mirrors torch semantics) for a correctness check
# ----------------------------------------------------------------------------
def reference(x, mask, params, num_heads):
    B, S, E = x.shape
    D = E // num_heads
    q = x @ params["wq"] + params["bq"]
    k = x @ params["wk"] + params["bk"]
    v = x @ params["wv"] + params["bv"]

    def split(t):  # (B,S,E) -> (B,H,S,D)
        return t.reshape(B, S, num_heads, D).transpose(0, 2, 1, 3)

    qh, kh, vh = split(q), split(k), split(v)
    s = jnp.einsum("bhqd,bhkd->bhqk", qh, kh) / math.sqrt(D) + mask
    p = jax.nn.softmax(s, axis=-1)
    o = jnp.einsum("bhqk,bhkd->bhqd", p, vh).transpose(0, 2, 1, 3).reshape(B, S, E)
    o = o @ params["wo"] + params["bo"]

    def ln(t, g, b):
        mu = jnp.mean(t, -1, keepdims=True)
        var = jnp.mean((t - mu) ** 2, -1, keepdims=True)
        return (t - mu) * jax.lax.rsqrt(var + 1e-5) * g + b

    h1 = ln(x + o, params["g1"], params["beta1"])
    z = jnp.maximum(h1 @ params["wl"] + params["bl"], 0.0)
    return ln(z, params["g2"], params["beta2"])


# ----------------------------------------------------------------------------
if __name__ == "__main__":
    B, S = 2, 8
    embed_dim, num_heads, linear_dim = 32, 4, 64

    key = jax.random.PRNGKey(0)
    keys = jax.random.split(key, 12)
    sc = 0.1

    # PyTorch linear is y = x @ W^T + b with W (out, in); we store transposed.
    params = {
        "wq": sc * jax.random.normal(keys[0], (embed_dim, embed_dim), jnp.float32),
        "wk": sc * jax.random.normal(keys[1], (embed_dim, embed_dim), jnp.float32),
        "wv": sc * jax.random.normal(keys[2], (embed_dim, embed_dim), jnp.float32),
        "bq": sc * jax.random.normal(keys[3], (1, embed_dim), jnp.float32),
        "bk": sc * jax.random.normal(keys[4], (1, embed_dim), jnp.float32),
        "bv": sc * jax.random.normal(keys[5], (1, embed_dim), jnp.float32),
        "wo": sc * jax.random.normal(keys[6], (embed_dim, embed_dim), jnp.float32),
        "bo": sc * jax.random.normal(keys[7], (1, embed_dim), jnp.float32),
        "g1": jnp.ones((1, embed_dim), jnp.float32),
        "beta1": jnp.zeros((1, embed_dim), jnp.float32),
        "wl": sc * jax.random.normal(keys[8], (embed_dim, linear_dim), jnp.float32),
        "bl": sc * jax.random.normal(keys[9], (1, linear_dim), jnp.float32),
        "g2": jnp.ones((1, linear_dim), jnp.float32),
        "beta2": jnp.zeros((1, linear_dim), jnp.float32),
    }

    x = jax.random.normal(keys[10], (B, S, embed_dim), jnp.float32)
    # Additive float attn_mask (causal), same semantics as a PyTorch float mask.
    row = jnp.arange(S)[:, None]
    col = jnp.arange(S)[None, :]
    attn_mask = jnp.where(col > row, -1e9, 0.0).astype(jnp.float32)

    # One-time parameter prep (done at model init in a real deployment).
    prepped = prepare_params(params, num_heads=num_heads)

    out = attention_block(x, attn_mask, prepped,
                          num_heads=num_heads, linear_dim=linear_dim)
    out = jax.block_until_ready(out)

    ref = reference(x, attn_mask, params, num_heads)
    assert out.shape == (B, S, linear_dim)
    # bf16 MXU operands (f32 accumulation, f32 softmax/LayerNorm) -> loose tolerance.
    err = float(jnp.max(jnp.abs(out - ref)))
    assert jnp.allclose(out, ref, atol=5e-2, rtol=5e-2), err

    print("KERNEL_OK")
</pallas_src>

<mosaic_0001>
module attributes {stable_mosaic.version = 11 : i64} {
  func.func @attention_block_kernel(%arg0: i32, %arg1: i32, %arg2: memref<1x8x32xf32, #tpu.memory_space<vmem>>, %arg3: memref<1x8x32xf32, #tpu.memory_space<vmem>>, %arg4: memref<8x8xf32, #tpu.memory_space<vmem>>, %arg5: memref<32x32xbf16, #tpu.memory_space<vmem>>, %arg6: memref<1x32xf32, #tpu.memory_space<vmem>>, %arg7: memref<32x64xbf16, #tpu.memory_space<vmem>>, %arg8: memref<1x64xf32, #tpu.memory_space<vmem>>, %arg9: memref<32x32xbf16, #tpu.memory_space<vmem>>, %arg10: memref<1x32xf32, #tpu.memory_space<vmem>>, %arg11: memref<1x32xf32, #tpu.memory_space<vmem>>, %arg12: memref<1x32xf32, #tpu.memory_space<vmem>>, %arg13: memref<32x128xbf16, #tpu.memory_space<vmem>>, %arg14: memref<1x128xf32, #tpu.memory_space<vmem>>, %arg15: memref<1x128xf32, #tpu.memory_space<vmem>>, %arg16: memref<1x128xf32, #tpu.memory_space<vmem>>, %arg17: memref<1x8x128xf32, #tpu.memory_space<vmem>>, %arg18: memref<4x8x8xbf16, #tpu.memory_space<vmem>>, %arg19: memref<4x8x1xf32, #tpu.memory_space<vmem>>, %arg20: memref<4x8x1xf32, #tpu.memory_space<vmem>>, %arg21: memref<4x8x8xf32, #tpu.memory_space<vmem>>) attributes {dimension_semantics = [#tpu.dimension_semantics<parallel>, #tpu.dimension_semantics<arbitrary>], iteration_bounds = array<i64: 2, 1>, scalar_prefetch = 0 : i64, scratch_operands = 4 : i64, tpu.core_type = #tpu.core_type<tc>, window_params = [{transform_indices = @transform_0, window_bounds = array<i64: 1, 8, 32>}, {transform_indices = @transform_1, window_bounds = array<i64: 1, 8, 32>}, {transform_indices = @transform_2, window_bounds = array<i64: 8, 8>}, {pipeline_mode = #tpu.pipeline_mode<synchronous>, transform_indices = @transform_3, window_bounds = array<i64: 32, 32>}, {pipeline_mode = #tpu.pipeline_mode<synchronous>, transform_indices = @transform_4, window_bounds = array<i64: 1, 32>}, {pipeline_mode = #tpu.pipeline_mode<synchronous>, transform_indices = @transform_5, window_bounds = array<i64: 32, 64>}, {pipeline_mode = #tpu.pipeline_mode<synchronous>, transform_indices = @transform_6, window_bounds = array<i64: 1, 64>}, {pipeline_mode = #tpu.pipeline_mode<synchronous>, transform_indices = @transform_7, window_bounds = array<i64: 32, 32>}, {pipeline_mode = #tpu.pipeline_mode<synchronous>, transform_indices = @transform_8, window_bounds = array<i64: 1, 32>}, {pipeline_mode = #tpu.pipeline_mode<synchronous>, transform_indices = @transform_9, window_bounds = array<i64: 1, 32>}, {pipeline_mode = #tpu.pipeline_mode<synchronous>, transform_indices = @transform_10, window_bounds = array<i64: 1, 32>}, {pipeline_mode = #tpu.pipeline_mode<synchronous>, transform_indices = @transform_11, window_bounds = array<i64: 32, 128>}, {pipeline_mode = #tpu.pipeline_mode<synchronous>, transform_indices = @transform_12, window_bounds = array<i64: 1, 128>}, {pipeline_mode = #tpu.pipeline_mode<synchronous>, transform_indices = @transform_13, window_bounds = array<i64: 1, 128>}, {pipeline_mode = #tpu.pipeline_mode<synchronous>, transform_indices = @transform_14, window_bounds = array<i64: 1, 128>}, {transform_indices = @transform_15, window_bounds = array<i64: 1, 8, 128>}]} {
    %c0_i32 = arith.constant 0 : i32
    %0 = arith.cmpi eq, %arg1, %c0_i32 : i32
    %1 = arith.extui %0 : i1 to i32
    %c0_i32_0 = arith.constant 0 : i32
    %2 = arith.cmpi ne, %1, %c0_i32_0 : i32
    scf.if %2 {
      %c0_36 = arith.constant 0 : index
      %c0_37 = arith.constant 0 : index
      %c0_38 = arith.constant 0 : index
      %51 = vector.load %arg2[%c0_36, %c0_37, %c0_38] : memref<1x8x32xf32, #tpu.memory_space<vmem>>, vector<1x8x32xf32>
      %52 = arith.truncf %51 : vector<1x8x32xf32> to vector<1x8x32xbf16>
      %53 = vector.shape_cast %52 : vector<1x8x32xbf16> to vector<8x32xbf16>
      %c0_39 = arith.constant 0 : index
      %c0_40 = arith.constant 0 : index
      %54 = vector.load %arg5[%c0_39, %c0_40] : memref<32x32xbf16, #tpu.memory_space<vmem>>, vector<32x32xbf16>
      %cst_41 = arith.constant dense<0.000000e+00> : vector<8x32xf32>
      %55 = tpu.matmul %53, %54, %cst_41 {dimension_numbers = #tpu.dot_dimension_numbers<[1], [0], [0], [1], [0, 0, 1, 1], [], []>} : vector<8x32xbf16>, vector<32x32xbf16>, vector<8x32xf32> -> vector<8x32xf32>
      %c0_42 = arith.constant 0 : index
      %c0_43 = arith.constant 0 : index
      %56 = vector.load %arg6[%c0_42, %c0_43] : memref<1x32xf32, #tpu.memory_space<vmem>>, vector<1x32xf32>
      %57 = vector.broadcast %56 : vector<1x32xf32> to vector<8x32xf32>
      %58 = arith.addf %55, %57 : vector<8x32xf32>
      %59 = vector.shape_cast %58 : vector<8x32xf32> to vector<8x4x8xf32>
      %60 = tpu.transpose %59, [1, 0, 2] : vector<8x4x8xf32> -> vector<4x8x8xf32>
      %61 = arith.truncf %60 : vector<4x8x8xf32> to vector<4x8x8xbf16>
      %c0_44 = arith.constant 0 : index
      %c0_45 = arith.constant 0 : index
      %c0_46 = arith.constant 0 : index
      %62 = vector.load %arg18[%c0_44, %c0_45, %c0_46] : memref<4x8x8xbf16, #tpu.memory_space<vmem>>, vector<4x8x8xbf16>
      tpu.vector_store %arg18[%c0_44, %c0_45, %c0_46], %61 {strides = array<i32>} : memref<4x8x8xbf16, #tpu.memory_space<vmem>>, vector<4x8x8xbf16>,
      %cst_47 = arith.constant 0xFF800000 : f32
      %63 = vector.broadcast %cst_47 : f32 to vector<4x8x1xf32>
      %c0_48 = arith.constant 0 : index
      %c0_49 = arith.constant 0 : index
      %c0_50 = arith.constant 0 : index
      %64 = vector.load %arg19[%c0_48, %c0_49, %c0_50] : memref<4x8x1xf32, #tpu.memory_space<vmem>>, vector<4x8x1xf32>
      tpu.vector_store %arg19[%c0_48, %c0_49, %c0_50], %63 {strides = array<i32>} : memref<4x8x1xf32, #tpu.memory_space<vmem>>, vector<4x8x1xf32>,
      %cst_51 = arith.constant 0.000000e+00 : f32
      %65 = vector.broadcast %cst_51 : f32 to vector<4x8x1xf32>
      %c0_52 = arith.constant 0 : index
      %c0_53 = arith.constant 0 : index
      %c0_54 = arith.constant 0 : index
      %66 = vector.load %arg20[%c0_52, %c0_53, %c0_54] : memref<4x8x1xf32, #tpu.memory_space<vmem>>, vector<4x8x1xf32>
      tpu.vector_store %arg20[%c0_52, %c0_53, %c0_54], %65 {strides = array<i32>} : memref<4x8x1xf32, #tpu.memory_space<vmem>>, vector<4x8x1xf32>,
      %cst_55 = arith.constant 0.000000e+00 : f32
      %67 = vector.broadcast %cst_55 : f32 to vector<4x8x8xf32>
      %c0_56 = arith.constant 0 : index
      %c0_57 = arith.constant 0 : index
      %c0_58 = arith.constant 0 : index
      %68 = vector.load %arg21[%c0_56, %c0_57, %c0_58] : memref<4x8x8xf32, #tpu.memory_space<vmem>>, vector<4x8x8xf32>
      tpu.vector_store %arg21[%c0_56, %c0_57, %c0_58], %67 {strides = array<i32>} : memref<4x8x8xf32, #tpu.memory_space<vmem>>, vector<4x8x8xf32>,
    } else {
    }
    %c0 = arith.constant 0 : index
    %c0_1 = arith.constant 0 : index
    %c0_2 = arith.constant 0 : index
    %3 = vector.load %arg3[%c0, %c0_1, %c0_2] : memref<1x8x32xf32, #tpu.memory_space<vmem>>, vector<1x8x32xf32>
    %4 = arith.truncf %3 : vector<1x8x32xf32> to vector<1x8x32xbf16>
    %5 = vector.shape_cast %4 : vector<1x8x32xbf16> to vector<8x32xbf16>
    %c0_3 = arith.constant 0 : index
    %c0_4 = arith.constant 0 : index
    %6 = vector.load %arg7[%c0_3, %c0_4] : memref<32x64xbf16, #tpu.memory_space<vmem>>, vector<32x64xbf16>
    %cst = arith.constant dense<0.000000e+00> : vector<8x64xf32>
    %7 = tpu.matmul %5, %6, %cst {dimension_numbers = #tpu.dot_dimension_numbers<[1], [0], [0], [1], [0, 0, 1, 1], [], []>} : vector<8x32xbf16>, vector<32x64xbf16>, vector<8x64xf32> -> vector<8x64xf32>
    %c0_5 = arith.constant 0 : index
    %c0_6 = arith.constant 0 : index
    %8 = vector.load %arg8[%c0_5, %c0_6] : memref<1x64xf32, #tpu.memory_space<vmem>>, vector<1x64xf32>
    %9 = vector.broadcast %8 : vector<1x64xf32> to vector<8x64xf32>
    %10 = arith.addf %7, %9 : vector<8x64xf32>
    %11 = vector.extract_strided_slice %10 {offsets = [0, 0], sizes = [8, 32], strides = [1, 1]} : vector<8x64xf32> to vector<8x32xf32>
    %12 = vector.shape_cast %11 : vector<8x32xf32> to vector<8x4x8xf32>
    %13 = tpu.transpose %12, [1, 0, 2] : vector<8x4x8xf32> -> vector<4x8x8xf32>
    %14 = arith.truncf %13 : vector<4x8x8xf32> to vector<4x8x8xbf16>
    %15 = vector.extract_strided_slice %10 {offsets = [0, 32], sizes = [8, 32], strides = [1, 1]} : vector<8x64xf32> to vector<8x32xf32>
    %16 = vector.shape_cast %15 : vector<8x32xf32> to vector<8x4x8xf32>
    %17 = tpu.transpose %16, [1, 0, 2] : vector<8x4x8xf32> -> vector<4x8x8xf32>
    %18 = arith.truncf %17 : vector<4x8x8xf32> to vector<4x8x8xbf16>
    %c0_7 = arith.constant 0 : index
    %c0_8 = arith.constant 0 : index
    %19 = vector.load %arg4[%c0_7, %c0_8] : memref<8x8xf32, #tpu.memory_space<vmem>>, vector<8x8xf32>
    %c0_9 = arith.constant 0 : index
    %c0_10 = arith.constant 0 : index
    %c0_11 = arith.constant 0 : index
    %20 = vector.load %arg18[%c0_9, %c0_10, %c0_11] : memref<4x8x8xbf16, #tpu.memory_space<vmem>>, vector<4x8x8xbf16>
    "tpu.trace_start"() <{level = 10 : i32, message = "nqd,nkd->nqk"}> : () -> ()
    %cst_12 = arith.constant dense<0.000000e+00> : vector<4x8x8xf32>
    %21 = tpu.matmul %20, %14, %cst_12 {dimension_numbers = #tpu.dot_dimension_numbers<[2], [2], [1], [1], [0, 0, 0, 1, 1, 1], [0], [0]>} : vector<4x8x8xbf16>, vector<4x8x8xbf16>, vector<4x8x8xf32> -> vector<4x8x8xf32>
    "tpu.trace_stop"() : () -> ()
    %22 = vector.shape_cast %19 : vector<8x8xf32> to vector<1x8x8xf32>
    %23 = vector.broadcast %22 : vector<1x8x8xf32> to vector<4x8x8xf32>
    %24 = arith.addf %21, %23 : vector<4x8x8xf32>
    %c0_13 = arith.constant 0 : index
    %c0_14 = arith.constant 0 : index
    %c0_15 = arith.constant 0 : index
    %25 = vector.load %arg19[%c0_13, %c0_14, %c0_15] : memref<4x8x1xf32, #tpu.memory_space<vmem>>, vector<4x8x1xf32>
    %cst_16 = arith.constant dense<0xFF800000> : vector<4x8xf32>
    %26 = vector.multi_reduction <maximumf>, %24, %cst_16 [2] : vector<4x8x8xf32> to vector<4x8xf32>
    %27 = vector.shape_cast %26 : vector<4x8xf32> to vector<4x8x1xf32>
    %28 = arith.maximumf %25, %27 : vector<4x8x1xf32>
    %29 = arith.subf %25, %28 : vector<4x8x1xf32>
    %30 = math.exp %29 : vector<4x8x1xf32>
    %31 = vector.broadcast %28 : vector<4x8x1xf32> to vector<4x8x8xf32>
    %32 = arith.subf %24, %31 : vector<4x8x8xf32>
    %33 = math.exp %32 : vector<4x8x8xf32>
    %c0_17 = arith.constant 0 : index
    %c0_18 = arith.constant 0 : index
    %c0_19 = arith.constant 0 : index
    %34 = vector.load %arg20[%c0_17, %c0_18, %c0_19] : memref<4x8x1xf32, #tpu.memory_space<vmem>>, vector<4x8x1xf32>
    %35 = arith.mulf %30, %34 : vector<4x8x1xf32>
    %cst_20 = arith.constant dense<0.000000e+00> : vector<4x8xf32>
    %36 = vector.multi_reduction <add>, %33, %cst_20 [2] : vector<4x8x8xf32> to vector<4x8xf32>
    %37 = vector.shape_cast %36 : vector<4x8xf32> to vector<4x8x1xf32>
    %38 = arith.addf %35, %37 : vector<4x8x1xf32>
    %c0_21 = arith.constant 0 : index
    %c0_22 = arith.constant 0 : index
    %c0_23 = arith.constant 0 : index
    %39 = vector.load %arg20[%c0_21, %c0_22, %c0_23] : memref<4x8x1xf32, #tpu.memory_space<vmem>>, vector<4x8x1xf32>
    tpu.vector_store %arg20[%c0_21, %c0_22, %c0_23], %38 {strides = array<i32>} : memref<4x8x1xf32, #tpu.memory_space<vmem>>, vector<4x8x1xf32>,
    %c0_24 = arith.constant 0 : index
    %c0_25 = arith.constant 0 : index
    %c0_26 = arith.constant 0 : index
    %40 = vector.load %arg21[%c0_24, %c0_25, %c0_26] : memref<4x8x8xf32, #tpu.memory_space<vmem>>, vector<4x8x8xf32>
    %41 = vector.broadcast %30 : vector<4x8x1xf32> to vector<4x8x8xf32>
    %42 = arith.mulf %41, %40 : vector<4x8x8xf32>
    %43 = arith.truncf %33 : vector<4x8x8xf32> to vector<4x8x8xbf16>
    "tpu.trace_start"() <{level = 10 : i32, message = "nqk,nkd->nqd"}> : () -> ()
    %cst_27 = arith.constant dense<0.000000e+00> : vector<4x8x8xf32>
    %44 = tpu.matmul %43, %18, %cst_27 {dimension_numbers = #tpu.dot_dimension_numbers<[2], [1], [1], [2], [0, 0, 0, 1, 1, 2], [0], [0]>} : vector<4x8x8xbf16>, vector<4x8x8xbf16>, vector<4x8x8xf32> -> vector<4x8x8xf32>
    "tpu.trace_stop"() : () -> ()
    %45 = arith.addf %42, %44 : vector<4x8x8xf32>
    %c0_28 = arith.constant 0 : index
    %c0_29 = arith.constant 0 : index
    %c0_30 = arith.constant 0 : index
    %46 = vector.load %arg21[%c0_28, %c0_29, %c0_30] : memref<4x8x8xf32, #tpu.memory_space<vmem>>, vector<4x8x8xf32>
    tpu.vector_store %arg21[%c0_28, %c0_29, %c0_30], %45 {strides = array<i32>} : memref<4x8x8xf32, #tpu.memory_space<vmem>>, vector<4x8x8xf32>,
    %c0_31 = arith.constant 0 : index
    %c0_32 = arith.constant 0 : index
    %c0_33 = arith.constant 0 : index
    %47 = vector.load %arg19[%c0_31, %c0_32, %c0_33] : memref<4x8x1xf32, #tpu.memory_space<vmem>>, vector<4x8x1xf32>
    tpu.vector_store %arg19[%c0_31, %c0_32, %c0_33], %28 {strides = array<i32>} : memref<4x8x1xf32, #tpu.memory_space<vmem>>, vector<4x8x1xf32>,
    %c0_i32_34 = arith.constant 0 : i32
    %48 = arith.cmpi eq, %arg1, %c0_i32_34 : i32
    %49 = arith.extui %48 : i1 to i32
    %c0_i32_35 = arith.constant 0 : i32
    %50 = arith.cmpi ne, %49, %c0_i32_35 : i32
    scf.if %50 {
      %c0_36 = arith.constant 0 : index
      %c0_37 = arith.constant 0 : index
      %c0_38 = arith.constant 0 : index
      %51 = vector.load %arg21[%c0_36, %c0_37, %c0_38] : memref<4x8x8xf32, #tpu.memory_space<vmem>>, vector<4x8x8xf32>
      %c0_39 = arith.constant 0 : index
      %c0_40 = arith.constant 0 : index
      %c0_41 = arith.constant 0 : index
      %52 = vector.load %arg20[%c0_39, %c0_40, %c0_41] : memref<4x8x1xf32, #tpu.memory_space<vmem>>, vector<4x8x1xf32>
      %53 = vector.broadcast %52 : vector<4x8x1xf32> to vector<4x8x8xf32>
      %54 = arith.divf %51, %53 : vector<4x8x8xf32>
      %55 = tpu.transpose %54, [1, 0, 2] : vector<4x8x8xf32> -> vector<8x4x8xf32>
      %56 = vector.shape_cast %55 : vector<8x4x8xf32> to vector<8x32xf32>
      %57 = arith.truncf %56 : vector<8x32xf32> to vector<8x32xbf16>
      %c0_42 = arith.constant 0 : index
      %c0_43 = arith.constant 0 : index
      %58 = vector.load %arg9[%c0_42, %c0_43] : memref<32x32xbf16, #tpu.memory_space<vmem>>, vector<32x32xbf16>
      %cst_44 = arith.constant dense<0.000000e+00> : vector<8x32xf32>
      %59 = tpu.matmul %57, %58, %cst_44 {dimension_numbers = #tpu.dot_dimension_numbers<[1], [0], [0], [1], [0, 0, 1, 1], [], []>} : vector<8x32xbf16>, vector<32x32xbf16>, vector<8x32xf32> -> vector<8x32xf32>
      %c0_45 = arith.constant 0 : index
      %c0_46 = arith.constant 0 : index
      %60 = vector.load %arg10[%c0_45, %c0_46] : memref<1x32xf32, #tpu.memory_space<vmem>>, vector<1x32xf32>
      %61 = vector.broadcast %60 : vector<1x32xf32> to vector<8x32xf32>
      %62 = arith.addf %59, %61 : vector<8x32xf32>
      %c0_47 = arith.constant 0 : index
      %c0_48 = arith.constant 0 : index
      %c0_49 = arith.constant 0 : index
      %63 = vector.load %arg2[%c0_47, %c0_48, %c0_49] : memref<1x8x32xf32, #tpu.memory_space<vmem>>, vector<1x8x32xf32>
      %64 = vector.shape_cast %63 : vector<1x8x32xf32> to vector<8x32xf32>
      %65 = arith.addf %64, %62 : vector<8x32xf32>
      %cst_50 = arith.constant dense<0.000000e+00> : vector<8xf32>
      %66 = vector.multi_reduction <add>, %65, %cst_50 [1] : vector<8x32xf32> to vector<8xf32>
      %67 = vector.shape_cast %66 : vector<8xf32> to vector<8x1xf32>
      %cst_51 = arith.constant 3.200000e+01 : f32
      %68 = vector.broadcast %cst_51 : f32 to vector<8x1xf32>
      %69 = arith.divf %67, %68 : vector<8x1xf32>
      %70 = vector.broadcast %69 : vector<8x1xf32> to vector<8x32xf32>
      %71 = arith.subf %65, %70 : vector<8x32xf32>
      %72 = arith.mulf %71, %71 : vector<8x32xf32>
      %cst_52 = arith.constant dense<0.000000e+00> : vector<8xf32>
      %73 = vector.multi_reduction <add>, %72, %cst_52 [1] : vector<8x32xf32> to vector<8xf32>
      %74 = vector.shape_cast %73 : vector<8xf32> to vector<8x1xf32>
      %cst_53 = arith.constant 3.200000e+01 : f32
      %75 = vector.broadcast %cst_53 : f32 to vector<8x1xf32>
      %76 = arith.divf %74, %75 : vector<8x1xf32>
      %77 = vector.broadcast %69 : vector<8x1xf32> to vector<8x32xf32>
      %78 = arith.subf %65, %77 : vector<8x32xf32>
      %cst_54 = arith.constant 9.99999974E-6 : f32
      %79 = vector.broadcast %cst_54 : f32 to vector<8x1xf32>
      %80 = arith.addf %76, %79 : vector<8x1xf32>
      %81 = math.rsqrt %80 : vector<8x1xf32>
      %82 = vector.broadcast %81 : vector<8x1xf32> to vector<8x32xf32>
      %83 = arith.mulf %78, %82 : vector<8x32xf32>
      %c0_55 = arith.constant 0 : index
      %c0_56 = arith.constant 0 : index
      %84 = vector.load %arg11[%c0_55, %c0_56] : memref<1x32xf32, #tpu.memory_space<vmem>>, vector<1x32xf32>
      %85 = vector.broadcast %84 : vector<1x32xf32> to vector<8x32xf32>
      %86 = arith.mulf %83, %85 : vector<8x32xf32>
      %c0_57 = arith.constant 0 : index
      %c0_58 = arith.constant 0 : index
      %87 = vector.load %arg12[%c0_57, %c0_58] : memref<1x32xf32, #tpu.memory_space<vmem>>, vector<1x32xf32>
      %88 = vector.broadcast %87 : vector<1x32xf32> to vector<8x32xf32>
      %89 = arith.addf %86, %88 : vector<8x32xf32>
      %90 = arith.truncf %89 : vector<8x32xf32> to vector<8x32xbf16>
      %c0_59 = arith.constant 0 : index
      %c0_60 = arith.constant 0 : index
      %91 = vector.load %arg13[%c0_59, %c0_60] : memref<32x128xbf16, #tpu.memory_space<vmem>>, vector<32x128xbf16>
      %cst_61 = arith.constant dense<0.000000e+00> : vector<8x128xf32>
      %92 = tpu.matmul %90, %91, %cst_61 {dimension_numbers = #tpu.dot_dimension_numbers<[1], [0], [0], [1], [0, 0, 1, 1], [], []>} : vector<8x32xbf16>, vector<32x128xbf16>, vector<8x128xf32> -> vector<8x128xf32>
      %c0_62 = arith.constant 0 : index
      %c0_63 = arith.constant 0 : index
      %93 = vector.load %arg14[%c0_62, %c0_63] : memref<1x128xf32, #tpu.memory_space<vmem>>, vector<1x128xf32>
      %94 = vector.broadcast %93 : vector<1x128xf32> to vector<8x128xf32>
      %95 = arith.addf %92, %94 : vector<8x128xf32>
      %cst_64 = arith.constant 0.000000e+00 : f32
      %96 = vector.broadcast %cst_64 : f32 to vector<8x128xf32>
      %97 = arith.maximumf %95, %96 : vector<8x128xf32>
      %cst_65 = arith.constant dense<0.000000e+00> : vector<8xf32>
      %98 = vector.multi_reduction <add>, %97, %cst_65 [1] : vector<8x128xf32> to vector<8xf32>
      %99 = vector.shape_cast %98 : vector<8xf32> to vector<8x1xf32>
      %cst_66 = arith.constant 1.562500e-02 : f32
      %100 = vector.broadcast %cst_66 : f32 to vector<8x1xf32>
      %101 = arith.mulf %99, %100 : vector<8x1xf32>
      %102 = vector.broadcast %101 : vector<8x1xf32> to vector<8x128xf32>
      %103 = arith.subf %97, %102 : vector<8x128xf32>
      %104 = tpu.iota {dimensions = array<i32: 1>} : vector<1x128xi32>
      %c64_i32 = arith.constant 64 : i32
      %105 = vector.broadcast %c64_i32 : i32 to vector<1x128xi32>
      %106 = arith.cmpi slt, %104, %105 : vector<1x128xi32>
      %cst_67 = arith.constant 0.000000e+00 : f32
      %107 = vector.shape_cast %106 : vector<1x128xi1> to vector<1x128xi1>
      %108 = vector.broadcast %107 : vector<1x128xi1> to vector<8x128xi1>
      %109 = vector.broadcast %cst_67 : f32 to vector<8x128xf32>
      %110 = arith.select %108, %103, %109 : vector<8x128xi1>, vector<8x128xf32>
      %111 = arith.mulf %110, %110 : vector<8x128xf32>
      %cst_68 = arith.constant dense<0.000000e+00> : vector<8xf32>
      %112 = vector.multi_reduction <add>, %111, %cst_68 [1] : vector<8x128xf32> to vector<8xf32>
      %113 = vector.shape_cast %112 : vector<8xf32> to vector<8x1xf32>
      %cst_69 = arith.constant 1.562500e-02 : f32
      %114 = vector.broadcast %cst_69 : f32 to vector<8x1xf32>
      %115 = arith.mulf %113, %114 : vector<8x1xf32>
      %cst_70 = arith.constant 9.99999974E-6 : f32
      %116 = vector.broadcast %cst_70 : f32 to vector<8x1xf32>
      %117 = arith.addf %115, %116 : vector<8x1xf32>
      %118 = math.rsqrt %117 : vector<8x1xf32>
      %119 = vector.broadcast %118 : vector<8x1xf32> to vector<8x128xf32>
      %120 = arith.mulf %110, %119 : vector<8x128xf32>
      %c0_71 = arith.constant 0 : index
      %c0_72 = arith.constant 0 : index
      %121 = vector.load %arg15[%c0_71, %c0_72] : memref<1x128xf32, #tpu.memory_space<vmem>>, vector<1x128xf32>
      %122 = vector.broadcast %121 : vector<1x128xf32> to vector<8x128xf32>
      %123 = arith.mulf %120, %122 : vector<8x128xf32>
      %c0_73 = arith.constant 0 : index
      %c0_74 = arith.constant 0 : index
      %124 = vector.load %arg16[%c0_73, %c0_74] : memref<1x128xf32, #tpu.memory_space<vmem>>, vector<1x128xf32>
      %125 = vector.broadcast %124 : vector<1x128xf32> to vector<8x128xf32>
      %126 = arith.addf %123, %125 : vector<8x128xf32>
      %127 = vector.shape_cast %126 : vector<8x128xf32> to vector<1x8x128xf32>
      %c0_75 = arith.constant 0 : index
      %c0_76 = arith.constant 0 : index
      %c0_77 = arith.constant 0 : index
      %128 = vector.load %arg17[%c0_75, %c0_76, %c0_77] : memref<1x8x128xf32, #tpu.memory_space<vmem>>, vector<1x8x128xf32>
      tpu.vector_store %arg17[%c0_75, %c0_76, %c0_77], %127 {strides = array<i32>} : memref<1x8x128xf32, #tpu.memory_space<vmem>>, vector<1x8x128xf32>,
    } else {
    }
    return
  }
  func.func @transform_0(%arg0: i32, %arg1: i32) -> (i32, i32, i32) {
    %c0_i32 = arith.constant 0 : i32
    %c0_i32_0 = arith.constant 0 : i32
    %c0_i32_1 = arith.constant 0 : i32
    return %arg0, %c0_i32, %c0_i32_0 : i32, i32, i32
  }
  func.func @transform_1(%arg0: i32, %arg1: i32) -> (i32, i32, i32) {
    %c0_i32 = arith.constant 0 : i32
    %c0_i32_0 = arith.constant 0 : i32
    return %arg0, %arg1, %c0_i32 : i32, i32, i32
  }
  func.func @transform_2(%arg0: i32, %arg1: i32) -> (i32, i32) {
    %c0_i32 = arith.constant 0 : i32
    %c0_i32_0 = arith.constant 0 : i32
    return %c0_i32, %arg1 : i32, i32
  }
  func.func @transform_3(%arg0: i32, %arg1: i32) -> (i32, i32) {
    %c0_i32 = arith.constant 0 : i32
    %c0_i32_0 = arith.constant 0 : i32
    %c0_i32_1 = arith.constant 0 : i32
    return %c0_i32, %c0_i32_0 : i32, i32
  }
  func.func @transform_4(%arg0: i32, %arg1: i32) -> (i32, i32) {
    %c0_i32 = arith.constant 0 : i32
    %c0_i32_0 = arith.constant 0 : i32
    %c0_i32_1 = arith.constant 0 : i32
    return %c0_i32, %c0_i32_0 : i32, i32
  }
  func.func @transform_5(%arg0: i32, %arg1: i32) -> (i32, i32) {
    %c0_i32 = arith.constant 0 : i32
    %c0_i32_0 = arith.constant 0 : i32
    %c0_i32_1 = arith.constant 0 : i32
    return %c0_i32, %c0_i32_0 : i32, i32
  }
  func.func @transform_6(%arg0: i32, %arg1: i32) -> (i32, i32) {
    %c0_i32 = arith.constant 0 : i32
    %c0_i32_0 = arith.constant 0 : i32
    %c0_i32_1 = arith.constant 0 : i32
    return %c0_i32, %c0_i32_0 : i32, i32
  }
  func.func @transform_7(%arg0: i32, %arg1: i32) -> (i32, i32) {
    %c0_i32 = arith.constant 0 : i32
    %c0_i32_0 = arith.constant 0 : i32
    %c0_i32_1 = arith.constant 0 : i32
    return %c0_i32, %c0_i32_0 : i32, i32
  }
  func.func @transform_8(%arg0: i32, %arg1: i32) -> (i32, i32) {
    %c0_i32 = arith.constant 0 : i32
    %c0_i32_0 = arith.constant 0 : i32
    %c0_i32_1 = arith.constant 0 : i32
    return %c0_i32, %c0_i32_0 : i32, i32
  }
  func.func @transform_9(%arg0: i32, %arg1: i32) -> (i32, i32) {
    %c0_i32 = arith.constant 0 : i32
    %c0_i32_0 = arith.constant 0 : i32
    %c0_i32_1 = arith.constant 0 : i32
    return %c0_i32, %c0_i32_0 : i32, i32
  }
  func.func @transform_10(%arg0: i32, %arg1: i32) -> (i32, i32) {
    %c0_i32 = arith.constant 0 : i32
    %c0_i32_0 = arith.constant 0 : i32
    %c0_i32_1 = arith.constant 0 : i32
    return %c0_i32, %c0_i32_0 : i32, i32
  }
  func.func @transform_11(%arg0: i32, %arg1: i32) -> (i32, i32) {
    %c0_i32 = arith.constant 0 : i32
    %c0_i32_0 = arith.constant 0 : i32
    %c0_i32_1 = arith.constant 0 : i32
    return %c0_i32, %c0_i32_0 : i32, i32
  }
  func.func @transform_12(%arg0: i32, %arg1: i32) -> (i32, i32) {
    %c0_i32 = arith.constant 0 : i32
    %c0_i32_0 = arith.constant 0 : i32
    %c0_i32_1 = arith.constant 0 : i32
    return %c0_i32, %c0_i32_0 : i32, i32
  }
  func.func @transform_13(%arg0: i32, %arg1: i32) -> (i32, i32) {
    %c0_i32 = arith.constant 0 : i32
    %c0_i32_0 = arith.constant 0 : i32
    %c0_i32_1 = arith.constant 0 : i32
    return %c0_i32, %c0_i32_0 : i32, i32
  }
  func.func @transform_14(%arg0: i32, %arg1: i32) -> (i32, i32) {
    %c0_i32 = arith.constant 0 : i32
    %c0_i32_0 = arith.constant 0 : i32
    %c0_i32_1 = arith.constant 0 : i32
    return %c0_i32, %c0_i32_0 : i32, i32
  }
  func.func @transform_15(%arg0: i32, %arg1: i32) -> (i32, i32, i32) {
    %c0_i32 = arith.constant 0 : i32
    %c0_i32_0 = arith.constant 0 : i32
    %c0_i32_1 = arith.constant 0 : i32
    return %arg0, %c0_i32, %c0_i32_0 : i32, i32, i32
  }
}

</mosaic_0001>

<bundles_post_ra>
// kernel: tpu_custom_call.1
= control target key start
LH: loop header
LB: loop body
LE: loop exit
PB: predicated region body
PF: predicated region fallthrough
CT: control target
= control target key end

     0   :  { %s3711_s0 = inlined_call_operand.hbm [shape: f32[2,8,32], index: 0, kind: input, shape index: {}]   ;;  %s3712_s1 = inlined_call_operand.hbm [shape: f32[2,8,32], index: 1, kind: input, shape index: {}]   ;;  %s3713_s2 = inlined_call_operand.hbm [shape: f32[8,8], index: 2, kind: input, shape index: {}]   ;;  %s3714_s3 = inlined_call_operand.hbm [shape: bf16[32,32], index: 3, kind: input, shape index: {}]   ;;  %s3715_s4 = inlined_call_operand.vmem [shape: f32[1,32], index: 4, kind: input, shape index: {}]   ;;  %s3716_s5 = inlined_call_operand.vmem [shape: bf16[32,64], index: 5, kind: input, shape index: {}]   ;;  %s3717_s6 = inlined_call_operand.vmem [shape: f32[1,64], index: 6, kind: input, shape index: {}]   ;;  %s3718_s7 = inlined_call_operand.hbm [shape: bf16[32,32], index: 7, kind: input, shape index: {}]   ;;  %s3719_s8 = inlined_call_operand.hbm [shape: f32[1,32], index: 8, kind: input, shape index: {}]   ;;  %s3720_s9 = inlined_call_operand.hbm [shape: f32[1,32], index: 9, kind: input, shape index: {}]   ;;  %s3721_s10 = inlined_call_operand.vmem [shape: f32[1,32], index: 10, kind: input, shape index: {}]   ;;  %s3722_s11 = inlined_call_operand.vmem [shape: bf16[32,128], index: 11, kind: input, shape index: {}]   ;;  %s3723_s12 = inlined_call_operand.vmem [shape: f32[1,128], index: 12, kind: input, shape index: {}]   ;;  %s3724_s13 = inlined_call_operand.vmem [shape: f32[1,128], index: 13, kind: input, shape index: {}]   ;;  %s3725_s14 = inlined_call_operand.vmem [shape: f32[1,128], index: 14, kind: input, shape index: {}]   ;;  %s3726_s15 = inlined_call_operand.hbm [shape: f32[2,8,128], index: 15, kind: output, shape index: {}]  }
   0x1   :  { %3737 = sst [smem:[#allocation28_spill]] %s3713_s2 }
   0x2   :  { %3738 = sst [smem:[#allocation29_spill]] %s3714_s3 }
   0x3   :  { %3739 = sst [smem:[#allocation30_spill]] %s3718_s7 }
   0x4   :  { %3740 = sst [smem:[#allocation31_spill]] %s3719_s8 }
   0x5   :  { %3741 = sst [smem:[#allocation32_spill]] %s3720_s9 }
   0x6   :  { %3742 = sst [smem:[#allocation33_spill]] %s3721_s10 }
   0x7   :  { %3743 = sst [smem:[#allocation34_spill]] %s3722_s11 }
   0x8   :  { %3744 = sst [smem:[#allocation35_spill]] %s3723_s12 }
   0x9   :  { %3745 = sst [smem:[#allocation36_spill]] %s3724_s13 }
   0xa   :  { %3746 = sst [smem:[#allocation37_spill]] %s3725_s14 }
   0xb   :  { %3747 = sst [smem:[#allocation38_spill]] %s3726_s15 }
   0xc   :  { %20 = vsyncpa [#allocation7], 0 }
   0xd   :  { %22 = vsyncpa [#allocation7 + $0x1], 0 }
   0xe   :  { %23 = vsyncpa [#allocation10], 0 }
   0xf   :  { %25 = vsyncpa [#allocation10 + $0x1], 0 }
  0x10   :  { %26 = vsyncpa [#allocation13], 0 }
  0x11   :  { %27 = vsyncpa [#allocation16], 0 }
  0x12   :  { %28 = vsyncpa [#allocation8], 0 }
  0x13   :  { %30 = vsyncpa [#allocation8 + $0x1], 0  ;;  %s3063_s18 = smov 0   ;;  %s3065_s19 = smov 0  }
  0x14   :  { %s3067_s20 = smov 0   ;;  %s3069_s21 = smov 0  }
  0x15   :  { %s3071_s22 = smov 0   ;;  %s3073_s23 = smov 0  }
  0x16 LB: > { %3748 = sst [smem:[#allocation25_spill]] %s2950_s21  ;;  %s3094_s24 = sadd.s32 4294967295, %s2958_s23   ;;  %s2958_s23 = sphi %s3073_s23, %s36_s23   ;;  %s2954_s22 = sphi %s3071_s22, %s3786_s22   ;;  %s2950_s21 = sphi %s3069_s21, %s3785_s21   ;;  %s2946_s20 = sphi %s3067_s20, %s3789_s20   ;;  %s2942_s19 = sphi %s3065_s19, %s3788_s19   ;;  %s2938_s18 = sphi %s3063_s18, %s3787_s18  }
  0x17   : > { %3749 = sst [smem:[#allocation26_spill]] %s2954_s22  ;;  %p2321_p0 = scmp.ge.s32.totalorder %s2958_s23, 1 }
  0x18   : > { %p3728_p1 = scmp.eq.s32.totalorder %s3094_s24, 0  ;;  %p411_p2 = scmp.lt.s32.totalorder %s2958_s23, 3 }
  0x19   : > { %s2960_s26 = smov [#allocation11]   ;;  %s2961_s28 = smov [#allocation12]  }
  0x1a   : > { %p3099_p3 = pnand %p2321_p0, %p411_p2  ;;  %s426_s27 = sshll.u32 %s2960_s26, 4  ;;  %s427_s27 = int_to_ptr.vmem [resolvable:$true] %s426_s27 }
  0x1b   : > { %s436_s29 = sshll.u32 %s2961_s28, 4  ;;  %s2962_s16 = smov [#allocation15]   ;;  %s3112_s29 = int_to_ptr.vmem [resolvable:$true] %s436_s29 }
  0x1c   : > { %s3750_s25 = scalar_select %p3099_p3, 1, 0 }
  0x1d   : > { %p2515_p5 = pneg %p3099_p3  ;;  %s3114_s17 = sshll.u32 %s2962_s16, 4  ;;  %s473_s17 = int_to_ptr.vmem [resolvable:$true] %s3114_s17 }
  0x1e   : > { %s3752_s2 = sld [smem:[#allocation28_spill]] }
  0x1f   : > { %p3108_p6 = pnand %p2515_p5, %p3728_p1 }
  0x21   : > { %p3124_p8 = pneg %p3108_p6 }
  0x24   : > { %s2660_s26 = scalar_lea.hbm %s3752_s2, 128 }
  0x25   : > { %p2661_p7 = scmp.ne.s32.totalorder %s3752_s2, %s2660_s26  ;;  %p2667_p11 = scmp.lt.u32.totalorder %s2660_s26, %s3752_s2 }
  0x27   : > { %p2663_p9 = pnand %p3124_p8, %p2661_p7 }
  0x29   : > { %p2664_p10 = pneg %p2663_p9 }
  0x2b   : > { %p2669_p12 = pnand %p2667_p11, %p2664_p10 }
  0x2d   : > { %2672 = shalt.err (!%p2669_p12)
}
  0x2e   : > { %s2673_s14 = scalar_lea.vmem %s427_s27, 128  ;;  %p2681_p5 = scmp.lt.s32.totalorder %s427_s27, %s427_s27 }
  0x2f   : > { %p2674_p13 = scmp.ne.s32.totalorder %s427_s27, %s2673_s14  ;;  %p2682_p4 = scmp.lt.s32.totalorder %s2673_s14, %s2673_s14 }
  0x31   : > { %p2676_p0 = pnand %p2674_p13, %p3124_p8  ;;  %p2683_p1 = por %p2682_p4, %p2681_p5 }
  0x33   : > { %p2677_p2 = pneg %p2676_p0 }
  0x35   : > { %p2684_p3 = pnand %p2683_p1, %p2677_p2 }
  0x37   : > { %2687 = shalt.err (!%p2684_p3)
}
  0x38   : > { %2518 = dma.hbm_to_vmem [thread:$0]  (!%p3108_p6), %s3752_s2, 128, %s427_s27, [#allocation10]  }
  0x39   : > { %s3754_s3 = sld [smem:[#allocation29_spill]] }
  0x3f   : > { %s2688_s26 = scalar_lea.hbm %s3754_s3, 256 }
  0x40   : > { %p2689_p7 = scmp.ne.s32.totalorder %s3754_s3, %s2688_s26  ;;  %p2695_p1 = scmp.lt.u32.totalorder %s2688_s26, %s3754_s3 }
  0x42   : > { %p2691_p9 = pnand %p2689_p7, %p3124_p8 }
  0x44   : > { %p2692_p4 = pneg %p2691_p9 }
  0x46   : > { %p2697_p3 = pnand %p2695_p1, %p2692_p4 }
  0x48   : > { %2700 = shalt.err (!%p2697_p3)
}
  0x49   : > { %s2701_s27 = scalar_lea.vmem %s3112_s29, 256  ;;  %p2709_p13 = scmp.lt.s32.totalorder %s3112_s29, %s3112_s29 }
  0x4a   : > { %p2702_p10 = scmp.ne.s32.totalorder %s3112_s29, %s2701_s27  ;;  %p2710_p0 = scmp.lt.s32.totalorder %s2701_s27, %s2701_s27 }
  0x4c   : > { %p2704_p11 = pnand %p2702_p10, %p3124_p8  ;;  %p2711_p2 = por %p2710_p0, %p2709_p13 }
  0x4e   : > { %p2705_p12 = pneg %p2704_p11 }
  0x50   : > { %p2712_p5 = pnand %p2711_p2, %p2705_p12 }
  0x52   : > { %2715 = shalt.err (!%p2712_p5)
}
  0x53   : > { %s3731_s10 = smov 64   ;;  %s3732_s11 = smov 4  }
  0x54   : > { %2521 = dma.hbm_to_vmem [thread:$0]  (!%p3108_p6), %s3754_s3, 256, %s3112_s29, [#allocation13], %s3731_s10, %s3731_s10, %s3732_s11  }
  0x55   : > { %s3755_s8 = sld [smem:[#allocation31_spill]] }
  0x5b   : > { %s2716_s26 = scalar_lea.hbm %s3755_s8, 16 }
  0x5c   : > { %p2717_p7 = scmp.ne.s32.totalorder %s3755_s8, %s2716_s26  ;;  %p2723_p1 = scmp.lt.u32.totalorder %s2716_s26, %s3755_s8 }
  0x5e   : > { %p2719_p9 = pnand %p2717_p7, %p3124_p8 }
  0x60   : > { %p2720_p4 = pneg %p2719_p9 }
  0x62   : > { %p2725_p3 = pnand %p2723_p1, %p2720_p4 }
  0x64   : > { %2728 = shalt.err (!%p2725_p3)
}
  0x65   : > { %s2729_s13 = scalar_lea.vmem %s473_s17, 16  ;;  %s2736_s29 = scalar_lea.vmem %s473_s17, 32 }
  0x66   : > { %p2730_p10 = scmp.ne.s32.totalorder %s473_s17, %s2729_s13  ;;  %p2737_p13 = scmp.lt.s32.totalorder %s473_s17, %s473_s17 }
  0x67   : > { %p2738_p0 = scmp.lt.s32.totalorder %s2736_s29, %s2729_s13 }
  0x68   : > { %p2732_p11 = pnand %p2730_p10, %p3124_p8 }
  0x69   : > { %p2739_p2 = por %p2738_p0, %p2737_p13 }
  0x6a   : > { %p2733_p12 = pneg %p2732_p11 }
  0x6c   : > { %p2740_p5 = pnand %p2739_p2, %p2733_p12 }
  0x6e   : > { %2743 = shalt.err (!%p2740_p5)
}
  0x6f   : > { %2527 = dma.hbm_to_vmem [thread:$0]  (!%p3108_p6), %s3755_s8, 16, %s473_s17, [#allocation16]  }
  0x70   : > { %s2965_s2 = smov [#allocation14]   ;;  %s2966_s26 = smov [#allocation17]  }
  0x71   : > { %s458_s21 = sshll.u32 %s2965_s2, 4  ;;  %s483_s16 = sshll.u32 %s2966_s26, 4  ;;  %s459_s21 = int_to_ptr.vmem [resolvable:$true] %s458_s21  ;;  %s484_s16 = int_to_ptr.vmem [resolvable:$true] %s483_s16 }
  0x72   : > { %s3756_s7 = sld [smem:[#allocation30_spill]] }
  0x78   : > { %s2744_s10 = scalar_lea.hbm %s3756_s7, 256 }
  0x79   : > { %p2745_p7 = scmp.ne.s32.totalorder %s3756_s7, %s2744_s10  ;;  %p2751_p1 = scmp.lt.u32.totalorder %s2744_s10, %s3756_s7 }
  0x7b   : > { %p2747_p9 = pnand %p2745_p7, %p3124_p8 }
  0x7d   : > { %p2748_p4 = pneg %p2747_p9 }
  0x7f   : > { %p2753_p3 = pnand %p2751_p1, %p2748_p4 }
  0x81   : > { %2756 = shalt.err (!%p2753_p3)
}
  0x82   : > { %s2757_s17 = scalar_lea.vmem %s459_s21, 256  ;;  %p2765_p13 = scmp.lt.s32.totalorder %s459_s21, %s459_s21 }
  0x83   : > { %p2758_p10 = scmp.ne.s32.totalorder %s459_s21, %s2757_s17  ;;  %p2766_p0 = scmp.lt.s32.totalorder %s2757_s17, %s2757_s17 }
  0x85   : > { %p2760_p11 = pnand %p2758_p10, %p3124_p8  ;;  %p2767_p2 = por %p2766_p0, %p2765_p13 }
  0x87   : > { %p2761_p12 = pneg %p2760_p11 }
  0x89   : > { %p2768_p5 = pnand %p2767_p2, %p2761_p12 }
  0x8b   : > { %2771 = shalt.err (!%p2768_p5)
}
  0x8c   : > { %s3757_s12 = smov 4   ;;  %s3758_s2 = smov 64  }
  0x8d   : > { %2524 = dma.hbm_to_vmem [thread:$0]  (!%p3108_p6), %s3756_s7, 256, %s459_s21, [#allocation13], %s3758_s2, %s3758_s2, %s3757_s12  }
  0x8e   : > { %s3759_s9 = sld [smem:[#allocation32_spill]] }
  0x94   : > { %s2772_s27 = scalar_lea.hbm %s3759_s9, 16 }
  0x95   : > { %p2773_p7 = scmp.ne.s32.totalorder %s3759_s9, %s2772_s27  ;;  %p2779_p1 = scmp.lt.u32.totalorder %s2772_s27, %s3759_s9 }
  0x97   : > { %p2775_p9 = pnand %p2773_p7, %p3124_p8 }
  0x99   : > { %p2776_p4 = pneg %p2775_p9 }
  0x9b   : > { %p2781_p3 = pnand %p2779_p1, %p2776_p4 }
  0x9d   : > { %2784 = shalt.err (!%p2781_p3)
}
  0x9e   : > { %s2785_s11 = scalar_lea.vmem %s484_s16, 16  ;;  %s2792_s21 = scalar_lea.vmem %s484_s16, 32 }
  0x9f   : > { %p2786_p10 = scmp.ne.s32.totalorder %s484_s16, %s2785_s11  ;;  %p2793_p13 = scmp.lt.s32.totalorder %s484_s16, %s484_s16 }
  0xa0   : > { %p2794_p0 = scmp.lt.s32.totalorder %s2792_s21, %s2785_s11 }
  0xa1   : > { %p2788_p11 = pnand %p2786_p10, %p3124_p8 }
  0xa2   : > { %p2795_p2 = por %p2794_p0, %p2793_p13 }
  0xa3   : > { %p2789_p12 = pneg %p2788_p11 }
  0xa5   : > { %p2796_p5 = pnand %p2795_p2, %p2789_p12 }
  0xa7   : > { %2799 = shalt.err (!%p2796_p5)
}
  0xa8   : > { %2530 = dma.hbm_to_vmem [thread:$0]  (!%p3108_p6), %s3759_s9, 16, %s484_s16, [#allocation16]  }
  0xa9   : > { %s2320_s28 = sadd.s32 4294967294, %s2958_s23   ;;  %s48_s10 = sadd.s32 1, %s2954_s22 }
  0xaa   : > { %s55_s30 = sadd.s32 1, %s2946_s20  ;;  %p50_p8 = scmp.ge.s32.totalorder %s48_s10, 2 }
  0xab   : > { %p62_p7 = scmp.ne.s32.totalorder %s2946_s20, %s2942_s19  ;;  %p63_p9 = scmp.eq.s32.totalorder %s2958_s23, 0 }
  0xac   : > { %p68_p4 = scmp.ne.s32.totalorder %s2942_s19, %s2938_s18  ;;  %s3791_s10 = smov (%p50_p8, %s48_s10), 0 }
  0xad   : > { %3760 = sst [smem:[#allocation27_spill]] %s3791_s10  ;;  %p3234_p1 = por %p63_p9, %p62_p7 }
  0xae   : > { %p3762_p3 = scmp.eq.s32.totalorder %s3094_s24, 0  ;;  %s52_s14 = ssub.s32 %s2954_s22, %s3791_s10 }
  0xaf   : > { %p398_p10 = scmp.eq.s32.totalorder %s3094_s24, 1  ;;  %p53_p11 = scmp.eq.s32.totalorder %s52_s14, 0 }
  0xb0   : > { %p3240_p6 = por %p3762_p3, %p68_p4  ;;  %p404_p12 = scmp.eq.s32.totalorder %s2320_s28, 1 }
  0xb1   : > { %p3247_p13 = por %p398_p10, %p62_p7  ;;  %p2547_p0 = scmp.lt.s32.totalorder %s2958_s23, 2 }
  0xb2   : > { %s3763_s16 = scalar_select %p3240_p6, 1, 0 }
  0xb3   : > { %s3764_s27 = scalar_select %p3247_p13, 1, 0 }
  0xb4   : > { %s3253_s13 = scalar_select %p53_p11, %s2946_s20, %s55_s30  }
  0xb5   : > { %p3255_p2 = por %p404_p12, %p68_p4  ;;  %s509_s15 = sand.u32 1, %s2946_s20  }
  0xb6   : > { %s3260_s17 = sshll.u32 %s509_s15, 3  ;;  %s2329_s11 = sshll.u32 %s2954_s22, 7 }
  0xb7   : > { %s3765_s29 = scalar_select %p3255_p2, 1, 0 }
  0xb8   : > { %s3266_s2 = scalar_lea.hbm %s3711_s0, %s2329_s11  ;;  %s513_s28 = scalar_lea.vmem [#allocation6], %s3260_s17 }
  0xb9   : > { %s520_s30 = sshll.u32 %s513_s28, 4  ;;  %p3273_p5 = pnand %p2547_p0, %p3234_p1  ;;  %s3269_s30 = int_to_ptr.vmem [resolvable:$true] %s520_s30 }
  0xba   : > { %s3280_s21 = scalar_lea.hbm %s3712_s1, %s2329_s11  ;;  %s527_s12 = sand.u32 1, %s2958_s23  }
  0xbb   : > { %s510_s8 = scalar_lea.sflag [#allocation7], %s509_s15  ;;  %s2800_s9 = scalar_lea.hbm %s3266_s2, 128 }
  0xbc   : > { %p2801_p8 = scmp.ne.s32.totalorder %s3266_s2, %s2800_s9  ;;  %p2802_p7 = pneg %p3273_p5 }
  0xbd   : > { %s2805_s10 = scalar_lea.hbm %s3711_s0, 256  ;;  %p2806_p1 = scmp.lt.u32.totalorder %s3266_s2, %s3711_s0 }
  0xbe   : > { %p2803_p9 = pnand %p2802_p7, %p2801_p8  ;;  %p2807_p3 = scmp.lt.u32.totalorder %s2805_s10, %s2800_s9 }
  0xbf   : > { %p2809_p11 = scmp.lt.u32.totalorder %s2800_s9, %s3266_s2 }
  0xc0   : > { %p2804_p4 = pneg %p2803_p9  ;;  %p2808_p10 = por %p2807_p3, %p2806_p1 }
  0xc2   : > { %p2810_p12 = por %p2809_p11, %p2808_p10 }
  0xc4   : > { %p2811_p0 = pnand %p2810_p12, %p2804_p4 }
  0xc6   : > { %2814 = shalt.err (!%p2811_p0)
}
  0xc7   : > { %s2815_s7 = scalar_lea.vmem %s3269_s30, 128  ;;  %s2967_s15 = smov [#allocation6]  }
  0xc8   : > { %p2816_p8 = scmp.ne.s32.totalorder %s3269_s30, %s2815_s7  ;;  %s2820_s11 = sshll.u32 %s2967_s15, 4  ;;  %s2821_s11 = int_to_ptr.vmem [resolvable:$false] %s2820_s11 }
  0xc9   : > { %s2822_s22 = scalar_lea.vmem %s2821_s11, 256  ;;  %p2823_p13 = scmp.lt.s32.totalorder %s3269_s30, %s2821_s11 }
  0xca   : > { %p2818_p9 = pnand %p2816_p8, %p2802_p7  ;;  %p2824_p1 = scmp.lt.s32.totalorder %s2822_s22, %s2815_s7 }
  0xcc   : > { %p2819_p2 = pneg %p2818_p9  ;;  %p2825_p3 = por %p2824_p1, %p2823_p13 }
  0xce   : > { %p2826_p10 = pnand %p2825_p3, %p2819_p2 }
  0xd0   : > { %2829 = shalt.err (!%p2826_p10)
}
  0xd1   : > { %2534 = dma.hbm_to_vmem [thread:$0]  (!%p3273_p5), %s3266_s2, 128, %s3269_s30, %s510_s8  }
  0xd2   : > { %s531_s9 = scalar_lea.vmem [#allocation9], %s3260_s17  ;;  %s528_s26 = scalar_lea.sflag [#allocation10], %s527_s12 }
  0xd3   : > { %s539_s10 = sshll.u32 %s531_s9, 4  ;;  %s2830_s28 = scalar_lea.hbm %s3280_s21, 128  ;;  %s540_s10 = int_to_ptr.vmem [resolvable:$true] %s539_s10 }
  0xd4   : > { %p2831_p13 = scmp.ne.s32.totalorder %s3280_s21, %s2830_s28  ;;  %s2835_s15 = scalar_lea.hbm %s3712_s1, 256 }
  0xd5   : > { %p2836_p11 = scmp.lt.u32.totalorder %s3280_s21, %s3712_s1  ;;  %p2837_p12 = scmp.lt.u32.totalorder %s2835_s15, %s2830_s28 }
  0xd6   : > { %p2833_p2 = pnand %p2831_p13, %p2802_p7  ;;  %p2839_p8 = scmp.lt.u32.totalorder %s2830_s28, %s3280_s21 }
  0xd7   : > { %p2838_p0 = por %p2837_p12, %p2836_p11 }
  0xd8   : > { %p2834_p4 = pneg %p2833_p2 }
  0xd9   : > { %p2840_p9 = por %p2839_p8, %p2838_p0 }
  0xdb   : > { %p2841_p1 = pnand %p2840_p9, %p2834_p4 }
  0xdd   : > { %2844 = shalt.err (!%p2841_p1)
}
  0xde   : > { %s2845_s8 = scalar_lea.vmem %s540_s10, 128  ;;  %s2968_s17 = smov [#allocation9]  }
  0xdf   : > { %p2846_p3 = scmp.ne.s32.totalorder %s540_s10, %s2845_s8  ;;  %s2850_s2 = sshll.u32 %s2968_s17, 4  ;;  %s2851_s2 = int_to_ptr.vmem [resolvable:$false] %s2850_s2 }
  0xe0   : > { %s2852_s30 = scalar_lea.vmem %s2851_s2, 256  ;;  %p2853_p2 = scmp.lt.s32.totalorder %s540_s10, %s2851_s2 }
  0xe1   : > { %p2848_p10 = pnand %p2846_p3, %p2802_p7  ;;  %p2854_p6 = scmp.lt.s32.totalorder %s2852_s30, %s2845_s8 }
  0xe3   : > { %p2849_p13 = pneg %p2848_p10  ;;  %p2855_p11 = por %p2854_p6, %p2853_p2 }
  0xe5   : > { %p2856_p12 = pnand %p2855_p11, %p2849_p13 }
  0xe7   : > { %2859 = shalt.err (!%p2856_p12)
}
  0xe8   : > { %2537 = dma.hbm_to_vmem [thread:$0]  (!%p3273_p5), %s3280_s21, 128, %s540_s10, %s528_s26  }
  0xe9   : > { %p3767_p4 = scmp.ne.s32.totalorder %s3750_s25, 0 }
  0xea   : > { %s3333_s12 = sand.u32 (!%p3767_p4), 1, %s2942_s19   ;;  %p3768_p6 = scmp.ne.s32.totalorder (!%p3767_p4), %s3763_s16, 0 }
  0xeb   : > { %548 = sbr.rel (%p3767_p4) target bundleno = 2652 (0xa5c), region = 80  ;;  %s3336_s9 = sshll.u32 (!%p3767_p4), %s3333_s12, 3 }
  0xec   : > { %s551_s28 = scalar_lea.sflag (!%p3767_p4), [#allocation7], %s3333_s12  ;;  %s554_s3 = scalar_lea.vmem (!%p3767_p4), [#allocation6], %s3336_s9 }
  0xf2   : > { %2913 = dma.done.wait (%p3768_p6), %s551_s28, 128  }
  0xf3   : > { %2915 = vsyncadd (%p3768_p6), %s551_s28, 4294967168  ;;  %s559_s25 = sand.u32 1, %s3094_s24   ;;  %s563_s21 = scalar_lea.vmem [#allocation9], %s3336_s9 }
  0xf4   : > { %s560_s14 = scalar_lea.sflag [#allocation10], %s559_s25 }
  0xf5   : > { %2917 = dma.done.wait (%p3768_p6), %s560_s14, 128  }
  0xf6   : > { %2919 = vsyncadd (%p3768_p6), %s560_s14, 4294967168  ;;  %p3769_p5 = scmp.eq.s32.totalorder %s3094_s24, 0 }
  0xf8   : > { %2921 = dma.done.wait (%p3769_p5), [#allocation10], 128   ;;  %p3770_p7 = pmov %p3769_p5 }
  0xf9   : > { %p3771_p0 = pmov %p3769_p5 }
  0xfa   : > { %2923 = vsyncadd (%p3770_p7), [#allocation10], 4294967168 }
  0xfb   : > { %2925 = dma.done.wait (%p3771_p0), [#allocation13], 512   ;;  %p3772_p8 = pmov %p3771_p0 }
  0xfc   : > { %p3773_p9 = pmov %p3771_p0 }
  0xfd   : > { %2927 = vsyncadd (%p3772_p8), [#allocation13], 4294966784 }
  0xfe   : > { %2929 = dma.done.wait (%p3773_p9), [#allocation16], 32   ;;  %p3774_p1 = pmov %p3771_p0 }
  0xff   : > { %v2969_v0 = vmov 0.0   ;;  %vm2970_vm0 = vmmov 0   ;;  %v2624_v1 = vld [vmem:[#allocation12] sm:$0xff]   ;;  %v2625_v2 = vld [vmem:[%s3716_s5] sm:$0xff]   ;;  %v2627_v4 = vld [vmem:[%s3716_s5 + $0x8] sm:$0xff]   ;;  %vm665_vm1 = vcmask 261120   ;;  %v724_v23 = vlaneseq }
 0x100   : > { %2931 = vsyncadd (%p3774_p1), [#allocation16], 4294967264  ;;  %2409 = vmatprep.subr.bf16.mxu0 %v2969_v0  ;;  %2417 = vmatprep.subr.bf16.mxu1 %v2969_v0  ;;  %v2626_v3 = vld [vmem:[#allocation12 + $0x8] sm:$0xff]   ;;  %v3376_v5 = vld [vmem:[%s554_s3] sm:$0xff]  ;;  %s2971_s8 = smov 104   ;;  %s2972_s17 = smov 120  }
 0x101   : > { %2413 = vmatprep.mubr.msk.bf16.mxu0 %vm2970_vm0, %v2969_v0  ;;  %2421 = vmatprep.mubr.msk.bf16.mxu1 %vm2970_vm0, %v2969_v0  ;;  %v878_v6 = vld [vmem:[%s563_s21] sm:$0xff]  ;;  %v641_v7 = vpack.c.bf16 %v3376_v5, %v3376_v5  ;;  %s2973_s2 = smov 112   ;;  %vm873_vm2 = vcmask 64512   ;;  %v2974_v21 = vmov 1983009808   ;;  %v725_v27 = vshrl.u32 %v724_v23, 7 }
 0x102   : > { %2410 = vmatpush3.bf16.msra.mxu0 %v2624_v1  ;;  %2418 = vmatpush3.bf16.msra.mxu1 %v2625_v2  ;;  %v879_v8 = vpack.c.bf16 %v878_v6, %v878_v6  ;;  %v2341_v9 = vld [vmem:[%s3715_s4] ss:$0 sm:$0xff]  ;;  %874 = vst.msk [vmem:[#allocation5] sm:$0xff] %vm873_vm2, %v2969_v0  ;;  %875 = vst.msk [vmem:[#allocation5 + $0x8] sm:$0xff] %vm873_vm2, %v2969_v0  ;;  %v722_v22 = vunpack.c.l.s4 %v2974_v21  ;;  %v2975_v24 = vmov 1934713408  }
 0x103   : > { %2411 = vmatprep.subr.bf16.mxu0 %v2969_v0  ;;  %2419 = vmatprep.subr.bf16.mxu1 %v2969_v0  ;;  %v2347_v11 = vld [vmem:[%s3717_s6] ss:$0 sm:$0xff]  ;;  %876 = vst.msk [vmem:[#allocation5 + $0x10] sm:$0xff] %vm873_vm2, %v2969_v0  ;;  %877 = vst.msk [vmem:[#allocation5 + $0x18] sm:$0xff] %vm873_vm2, %v2969_v0  ;;  %v754_v25 = vunpack.c.l.s4 %v2975_v24  ;;  %vm859_vm3 = vcmask 60416   ;;  %vm864_vm4 = vcmask 7168  }
 0x104   : > { %v723_v26 = vunpack.c.0.s8 %v722_v22  ;;  %869 = vst.msk [vmem:[#allocation4] sm:$0xff] %vm864_vm4, %v2969_v0  ;;  %870 = vst.msk [vmem:[#allocation4 + $0x8] sm:$0xff] %vm864_vm4, %v2969_v0  ;;  %s2978_s30 = smov 96   ;;  %vm1567_vm5 = vcmask 1043456   ;;  %s2979_s28 = smov 16   ;;  %vm1949_vm6 = vcmask 130048  }
 0x105   : > { %v755_v30 = vunpack.c.0.s8 %v754_v25  ;;  %871 = vst.msk [vmem:[#allocation4 + $0x10] sm:$0xff] %vm864_vm4, %v2969_v0  ;;  %872 = vst.msk [vmem:[#allocation4 + $0x18] sm:$0xff] %vm864_vm4, %v2969_v0  ;;  %s2980_s3 = smov 8   ;;  %s2981_s25 = smov 24   ;;  %vm1951_vm7 = vcmask 195584  }
 0x106   : > { %2412 = vmatpush3.bf16.msra.mxu0 %v2626_v3  ;;  %2420 = vmatpush3.bf16.msra.mxu1 %v2627_v4  ;;  %v3408_v31 = vsub.s32 %v723_v26, %v725_v27  ;;  %s3775_s16 = sld [smem:[#allocation34_spill]]  ;;  %s3776_s15 = sld [smem:[#allocation33_spill]] }
 0x107   : > { %2425 = vmatprep.subr.bf16.mxu0 %v2969_v0  ;;  %2431 = vmatprep.subr.bf16.mxu1 %v2969_v0  ;;  %v3412_v38 = vsub.s32 %v755_v30, %v725_v27  ;;  %s3780_s14 = sld [smem:[#allocation37_spill]]  ;;  %s634_s10 = scalar_lea.vmem [#allocation18], %s3336_s9 }
 0x108   : > { %s2168_s24 = sshll.u32 %s634_s10, 4  ;;  %s2155_s22 = scalar_lea.sflag [#allocation8], %s3333_s12  ;;  %s3664_s24 = int_to_ptr.vmem [resolvable:$true] %s2168_s24 }
 0x109   : > { %2414 = vmatmul.mubr.msk.bf16.vlgmr.msra.gmra.mrb[0].mxu0 %vm665_vm1, %v641_v7  ;;  %2422 = vmatmul.mubr.msk.bf16.vlgmr.msra.gmra.mrb[0].mxu1 %vm665_vm1, %v879_v8  ;;  %p3782_p10 = scmp.ne.s32.totalorder %s3764_s27, 0  ;;  %s2982_s9 = smov [#allocation18]  }
 0x10a   : > { %2427 = vmatprep.mubr.msk.bf16.mxu0 %vm2970_vm0, %v2969_v0  ;;  %2433 = vmatprep.mubr.msk.bf16.mxu1 %vm2970_vm0, %v2969_v0 }
 0x1dc   : > { %v703_v10 = vpop.f32.mrb[0].mxu0  ;;  %v941_v14 = vpop.f32.mrb[0].mxu1 }
 0x1dd   : > { %v704_v12 = vadd.f32 %v2341_v9, %v703_v10  ;;  %v2415_v13 = vpop.f32.mrb[1].mxu0  ;;  %v2423_v16 = vpop.f32.mrb[1].mxu1  ;;  %v3394_v17 = vadd.f32 %v2347_v11, %v941_v14 }
 0x1de   : > { %v706_v15 = vpop.f32.mrb[2].mxu0  ;;  %v944_v18 = vpop.f32.mrb[2].mxu1 }
 0x1df   : > { %716 = vrot.lane.b32.xlu1 %v704_v12, %s2971_s8  ;;  %710 = vrot.lane.b32.xlu0 %v704_v12, %s2972_s17  ;;  %v2416_v19 = vpop.f32.mrb[3].mxu0  ;;  %v2424_v20 = vpop.f32.mrb[3].mxu1 }
 0x1e3   : > { %948 = vrot.lane.b32.xlu1 %v3394_v17, %s2972_s17  ;;  %713 = vrot.lane.b32.xlu0 %v704_v12, %s2973_s2  ;;  %s3778_s17 = sld [smem:[#allocation25_spill]] }
 0x1e7   : > { %954 = vrot.lane.b32.xlu1 %v3394_v17, %s2971_s8  ;;  %951 = vrot.lane.b32.xlu0 %v3394_v17, %s2973_s2  ;;  %s3777_s8 = sld [smem:[#allocation35_spill]] }
 0x1e9   : > { %s2378_s21 = sshll.u32 %s3778_s17, 7  ;;  %s2864_s17 = sshll.u32 %s2982_s9, 4  ;;  %s2865_s17 = int_to_ptr.vmem [resolvable:$false] %s2864_s17 }
 0x1ea   : > { %s2866_s2 = scalar_lea.vmem %s2865_s17, 256  ;;  %p2867_p11 = scmp.lt.s32.totalorder %s3664_s24, %s2865_s17 }
 0x251   : > { %v717_v28 = vpop.permute.xlu1 %716  ;;  %v711_v29 = vpop.permute.xlu0 %710 }
 0x252   : > { %v735_v32 = vcombine.low %v711_v29, %v717_v28  ;;  %v736_v33 = vcombine.high %v711_v29, %v717_v28 }
 0x254   : > { %v743_v39 = vrot.slane %v735_v32, %v3408_v31  ;;  %v750_v40 = vrot.slane %v736_v33, %v3408_v31 }
 0x255   : > { %v3410_v34 = vpop.permute.xlu1 %948  ;;  %v714_v35 = vpop.permute.xlu0 %713 }
 0x256   : > { %v719_v36 = vcombine.low %v704_v12, %v714_v35  ;;  %v720_v37 = vcombine.high %v704_v12, %v714_v35 }
 0x258   : > { %v727_v41 = vrot.slane %v719_v36, %v3408_v31  ;;  %v734_v42 = vrot.slane %v720_v37, %v3408_v31 }
 0x259   : > { %v3418_v43 = vpop.permute.xlu1 %954  ;;  %v3420_v44 = vpop.permute.xlu0 %951 }
 0x25a   : > { %v751_v45 = vcombine.low %v727_v41, %v743_v39  ;;  %v752_v46 = vcombine.high %v727_v41, %v743_v39  ;;  %v767_v47 = vcombine.low %v734_v42, %v750_v40  ;;  %v768_v48 = vcombine.high %v734_v42, %v750_v40 }
 0x25b   : > { %v973_v49 = vcombine.low %v3410_v34, %v3418_v43  ;;  %v974_v50 = vcombine.high %v3410_v34, %v3418_v43  ;;  %v957_v51 = vcombine.low %v3394_v17, %v3420_v44  ;;  %v958_v52 = vcombine.high %v3394_v17, %v3420_v44 }
 0x25c   : > { %v759_v53 = vrot.slane %v751_v45, %v3412_v38  ;;  %v766_v54 = vrot.slane %v752_v46, %v3412_v38  ;;  %v775_v55 = vrot.slane %v767_v47, %v3412_v38  ;;  %v782_v56 = vrot.slane %v768_v48, %v3412_v38 }
 0x25d   : > { %v981_v57 = vrot.slane %v973_v49, %v3408_v31  ;;  %v988_v58 = vrot.slane %v974_v50, %v3408_v31  ;;  %v965_v59 = vrot.slane %v957_v51, %v3408_v31  ;;  %v972_v60 = vrot.slane %v958_v52, %v3408_v31 }
 0x25e   : > { %v787_v61 = vcombine.low %v759_v53, %v766_v54  ;;  %v2345_v62 = vcombine.high %v759_v53, %v766_v54  ;;  %v803_v63 = vcombine.low %v775_v55, %v782_v56  ;;  %v2346_v1 = vcombine.high %v775_v55, %v782_v56 }
 0x25f   : > { %v989_v2 = vcombine.low %v965_v59, %v981_v57  ;;  %v990_v3 = vcombine.high %v965_v59, %v981_v57  ;;  %v1005_v4 = vcombine.low %v972_v60, %v988_v58  ;;  %v1006_v6 = vcombine.high %v972_v60, %v988_v58 }
 0x260   : > { %v794_v7 = vrot.slane %v787_v61, %v3408_v31  ;;  %v802_v8 = vrot.slane %v2345_v62, %v3408_v31  ;;  %v810_v9 = vrot.slane %v803_v63, %v3408_v31  ;;  %v818_v10 = vrot.slane %v2346_v1, %v3408_v31 }
 0x261   : > { %v997_v11 = vrot.slane %v989_v2, %v3412_v38  ;;  %v1004_v12 = vrot.slane %v990_v3, %v3412_v38  ;;  %v1013_v13 = vrot.slane %v1005_v4, %v3412_v38  ;;  %v1020_v14 = vrot.slane %v1006_v6, %v3412_v38 }
 0x262   : > { %v819_v15 = vcombine.low %v794_v7, %v802_v8  ;;  %v820_v16 = vcombine.high %v794_v7, %v802_v8  ;;  %v835_v18 = vcombine.low %v810_v9, %v818_v10  ;;  %v836_v19 = vcombine.high %v810_v9, %v818_v10  ;;  %v1249_v9 = vld [vmem:[#allocation11] sm:$0xff] }
 0x263   : > { %v1025_v20 = vcombine.low %v997_v11, %v1004_v12  ;;  %v2351_v21 = vcombine.high %v997_v11, %v1004_v12  ;;  %v1041_v22 = vcombine.low %v1013_v13, %v1020_v14  ;;  %v2352_v24 = vcombine.high %v1013_v13, %v1020_v14 }
 0x264   : > { %v827_v25 = vrot.slane %v819_v15, %v3412_v38  ;;  %v834_v26 = vrot.slane %v820_v16, %v3412_v38  ;;  %v843_v27 = vrot.slane %v835_v18, %v3412_v38  ;;  %v850_v28 = vrot.slane %v836_v19, %v3412_v38 }
 0x265   : > { %v1032_v29 = vrot.slane %v1025_v20, %v3408_v31  ;;  %v1040_v30 = vrot.slane %v2351_v21, %v3408_v31  ;;  %v1048_v32 = vrot.slane %v1041_v22, %v3408_v31  ;;  %v1056_v33 = vrot.slane %v2352_v24, %v3408_v31 }
 0x266   : > { %v851_v35 = vcombine.low %v827_v25, %v843_v27  ;;  %v852_v36 = vcombine.high %v827_v25, %v843_v27  ;;  %v853_v37 = vcombine.low %v834_v26, %v850_v28  ;;  %v854_v39 = vcombine.high %v834_v26, %v850_v28 }
 0x267   : > { %v1057_v40 = vcombine.low %v1032_v29, %v1040_v30  ;;  %v1073_v41 = vcombine.low %v1048_v32, %v1056_v33  ;;  %v1058_v42 = vcombine.high %v1032_v29, %v1040_v30  ;;  %v1074_v45 = vcombine.high %v1048_v32, %v1056_v33 }
 0x268   : > { %v855_v46 = vpack.c.bf16 %v851_v35, %v851_v35  ;;  %v856_v47 = vpack.c.bf16 %v852_v36, %v852_v36  ;;  %v857_v48 = vpack.c.bf16 %v853_v37, %v853_v37  ;;  %v858_v49 = vpack.c.bf16 %v854_v39, %v854_v39 }
 0x269   : > { %v1065_v50 = vrot.slane %v1057_v40, %v3412_v38  ;;  %v1081_v51 = vrot.slane %v1073_v41, %v3412_v38  ;;  %v1072_v54 = vrot.slane %v1058_v42, %v3412_v38  ;;  %v1088_v55 = vrot.slane %v1074_v45, %v3412_v38 }
 0x26a   : > { %860 = vst.msk [vmem:[#allocation2] sm:$0xf] %vm859_vm3, %v855_v46  ;;  %861 = vst.msk [vmem:[#allocation2 + $0x4] sm:$0xf] %vm859_vm3, %v856_v47  ;;  %v2976_v8 = vmov -inf   ;;  %v2977_v39 = vmov 0  }
 0x26b   : > { %862 = vst.msk [vmem:[#allocation2 + $0x8] sm:$0xf] %vm859_vm3, %v857_v48  ;;  %863 = vst.msk [vmem:[#allocation2 + $0xc] sm:$0xf] %vm859_vm3, %v858_v49  ;;  %v1089_v52 = vcombine.low %v1065_v50, %v1081_v51  ;;  %v1090_v53 = vcombine.high %v1065_v50, %v1081_v51  ;;  %v1091_v60 = vcombine.low %v1072_v54, %v1088_v55  ;;  %2623 = vset.pattern.permute.xlu1 %v2977_v39 }
 0x26c   : > { %v1092_v61 = vcombine.high %v1072_v54, %v1088_v55  ;;  %866 = vst.msk [vmem:[#allocation3 + $0x8] sm:$0xff] %vm864_vm4, %v2976_v8  ;;  %865 = vst.msk [vmem:[#allocation3] sm:$0xff] %vm864_vm4, %v2976_v8  ;;  %2622 = vset.pattern.permute.xlu0 %v2977_v39 }
 0x26d   : > { %v1093_v56 = vpack.c.bf16 %v1089_v52, %v1089_v52  ;;  %v1094_v57 = vpack.c.bf16 %v1090_v53, %v1090_v53  ;;  %v1095_v62 = vpack.c.bf16 %v1091_v60, %v1091_v60  ;;  %867 = vst.msk [vmem:[#allocation3 + $0x10] sm:$0xff] %vm864_vm4, %v2976_v8  ;;  %868 = vst.msk [vmem:[#allocation3 + $0x18] sm:$0xff] %vm864_vm4, %v2976_v8 }
 0x26e   : > { %v1096_v63 = vpack.c.bf16 %v1092_v61, %v1092_v61 }
 0x26f   : > { %v1259_v58 = vsel %vm873_vm2, %v1093_v56, 0  ;;  %v1305_v59 = vsel %vm873_vm2, %v1094_v57, 0  ;;  %v1351_v3 = vsel %vm873_vm2, %v1095_v62, 0 }
 0x270   : > { %2426 = vmatpush3.bf16.xpose.msra.mxu0 %v1259_v58  ;;  %2432 = vmatpush3.bf16.xpose.msra.mxu1 %v1305_v59  ;;  %v1397_v4 = vsel %vm873_vm2, %v1096_v63, 0 }
 0x271   : > { %2437 = vmatprep.subr.bf16.mxu0 %v2969_v0  ;;  %2443 = vmatprep.subr.bf16.mxu1 %v2969_v0  ;;  %v1250_v1 = vld [vmem:[#allocation2] sm:$0xf]  ;;  %v1251_v2 = vld [vmem:[#allocation2 + $0x4] sm:$0xf] }
 0x272   : > { %v1252_v6 = vld [vmem:[#allocation2 + $0x8] sm:$0xf]  ;;  %v1253_v7 = vld [vmem:[#allocation2 + $0xc] sm:$0xf] }
 0x273   : > { %v3514_v40 = vld [vmem:[#allocation3 + $0x8] sm:$0xff]  ;;  %v3516_v41 = vld [vmem:[#allocation3] sm:$0xff] }
 0x274   : > { %v3539_v51 = vld [vmem:[#allocation3 + $0x18] sm:$0xff] }
 0x277   : > { %2428 = vmatmul.mubr.msk.bf16.vlgmr.msra.gmra.mrb[4].mxu0 %vm873_vm2, %v1250_v1  ;;  %2434 = vmatmul.mubr.msk.bf16.vlgmr.msra.gmra.mrb[4].mxu1 %vm873_vm2, %v1251_v2 }
 0x278   : > { %2438 = vmatpush3.bf16.xpose.msra.mxu0 %v1351_v3  ;;  %2444 = vmatpush3.bf16.xpose.msra.mxu1 %v1397_v4 }
 0x279   : > { %2439 = vmatprep.mubr.msk.bf16.mxu0 %vm2970_vm0, %v2969_v0  ;;  %2445 = vmatprep.mubr.msk.bf16.mxu1 %vm2970_vm0, %v2969_v0 }
 0x27a   : > { %2449 = vmatprep.subr.bf16.mxu0 %v2969_v0  ;;  %2455 = vmatprep.subr.bf16.mxu1 %v2969_v0 }
 0x27f   : > { %2440 = vmatmul.mubr.msk.bf16.vlgmr.msra.gmra.mrb[8].mxu0 %vm873_vm2, %v1252_v6  ;;  %2446 = vmatmul.mubr.msk.bf16.vlgmr.msra.gmra.mrb[8].mxu1 %vm873_vm2, %v1253_v7 }
 0x280   : > { %2451 = vmatprep.mubr.msk.bf16.mxu0 %vm2970_vm0, %v2969_v0  ;;  %2457 = vmatprep.mubr.msk.bf16.mxu1 %vm2970_vm0, %v2969_v0 }
 0x34a   : > { %v1295_v10 = vpop.f32.mrb[4].mxu0  ;;  %v1341_v11 = vpop.f32.mrb[4].mxu1 }
 0x34b   : > { %v3494_v12 = vadd.f32 %v1295_v10, %v1249_v9  ;;  %v3496_v13 = vadd.f32 %v1341_v11, %v1249_v9  ;;  %v2429_v14 = vpop.f32.mrb[5].mxu0  ;;  %v2435_v15 = vpop.f32.mrb[5].mxu1 }
 0x34c   : > { %v1298_v16 = vpop.f32.mrb[6].mxu0  ;;  %v1344_v18 = vpop.f32.mrb[6].mxu1 }
 0x34d   : > { %v2430_v19 = vpop.f32.mrb[7].mxu0  ;;  %v2436_v20 = vpop.f32.mrb[7].mxu1  ;;  %v1446_v21 = vsel %vm873_vm2, %v3496_v13, -inf  ;;  %v1443_v22 = vsel %vm873_vm2, %v3494_v12, -inf }
 0x34e   : > { %1447 = vmax.xlane.f32.xlu1 %v1446_v21  ;;  %1444 = vmax.xlane.f32.xlu0 %v1443_v22 }
 0x352   : > { %v1387_v24 = vpop.f32.mrb[8].mxu0  ;;  %v1433_v25 = vpop.f32.mrb[8].mxu1 }
 0x353   : > { %v3502_v26 = vadd.f32 %v1387_v24, %v1249_v9  ;;  %v2441_v27 = vpop.f32.mrb[9].mxu0  ;;  %v2447_v28 = vpop.f32.mrb[9].mxu1  ;;  %v3504_v32 = vadd.f32 %v1433_v25, %v1249_v9 }
 0x354   : > { %v1390_v29 = vpop.f32.mrb[10].mxu0  ;;  %v1436_v30 = vpop.f32.mrb[10].mxu1 }
 0x355   : > { %v2442_v33 = vpop.f32.mrb[11].mxu0  ;;  %v2448_v35 = vpop.f32.mrb[11].mxu1  ;;  %v1449_v36 = vsel %vm873_vm2, %v3502_v26, -inf  ;;  %v1452_v37 = vsel %vm873_vm2, %v3504_v32, -inf }
 0x356   : > { %1450 = vmax.xlane.f32.xlu0 %v1449_v36 }
 0x35a   : > { %1453 = vmax.xlane.f32.xlu0 %v1452_v37 }
 0x35f   : > { %1097 = vrot.lane.b32.xlu1 %v3394_v17, %s2978_s30 }
 0x363   : > { %1101 = vrot.lane.b32.xlu1 %v3420_v44, %s2978_s30  ;;  %v3534_v44 = vld [vmem:[#allocation3 + $0x10] sm:$0xff] }
 0x367   : > { %1103 = vrot.lane.b32.xlu1 %v3418_v43, %s2978_s30 }
 0x370   : > { %1099 = vrot.lane.b32.xlu0 %v3410_v34, %s2978_s30 }
 0x3db   : > { %v1448_v42 = vpop.xlane.xlu1 %1447  ;;  %v1445_v45 = vpop.xlane.xlu0 %1444 }
 0x3dc   : > { %v3519_v46 = vmax.f32 %v3514_v40, %v1448_v42  ;;  %v3522_v47 = vmax.f32 %v3516_v41, %v1445_v45 }
 0x3de   : > { %v1460_v17 = vsub.f32 %v3514_v40, %v3519_v46  ;;  %1758 = vst.msk [vmem:[#allocation3 + $0x8] sm:$0xff] %vm864_vm4, %v3519_v46  ;;  %v1459_v34 = vsub.f32 %v3516_v41, %v3522_v47  ;;  %1757 = vst.msk [vmem:[#allocation3] sm:$0xff] %vm864_vm4, %v3522_v47  ;;  %1478 = vperm.xlu1 %2623, %v3519_v46   ;;  %1473 = vperm.xlu0 %2622, %v3522_v47   ;;  %v1504_v41 = vld [vmem:[#allocation4 + $0x8] sm:$0xff]  ;;  %v1503_v47 = vld [vmem:[#allocation4] sm:$0xff] }
 0x3df   : > { %v1098_v43 = vpop.permute.xlu1 %1097 }
 0x3e3   : > { %v1451_v48 = vpop.xlane.xlu0 %1450  ;;  %v1102_v50 = vpop.permute.xlu1 %1101 }
 0x3e4   : > { %v3537_v49 = vmax.f32 %v3534_v44, %v1451_v48  ;;  %v1109_v55 = vcombine.low %v1098_v43, %v1102_v50  ;;  %v1110_v56 = vcombine.high %v1098_v43, %v1102_v50 }
 0x3e6   : > { %v1461_v52 = vsub.f32 %v3534_v44, %v3537_v49  ;;  %1759 = vst.msk [vmem:[#allocation3 + $0x10] sm:$0xff] %vm864_vm4, %v3537_v49  ;;  %1483 = vperm.xlu1 %2623, %v3537_v49   ;;  %v1117_v62 = vrot.slane %v1109_v55, %v3408_v31  ;;  %v1124_v63 = vrot.slane %v1110_v56, %v3408_v31 }
 0x3e7   : > { %v1454_v53 = vpop.xlane.xlu0 %1453  ;;  %v1104_v58 = vpop.permute.xlu1 %1103 }
 0x3e8   : > { %v3547_v54 = vmax.f32 %v3539_v51, %v1454_v53 }
 0x3ea   : > { %v1462_v57 = vsub.f32 %v3539_v51, %v3547_v54  ;;  %1760 = vst.msk [vmem:[#allocation3 + $0x18] sm:$0xff] %vm864_vm4, %v3547_v54  ;;  %1488 = vperm.xlu0 %2622, %v3547_v54   ;;  %v1505_v51 = vld [vmem:[#allocation4 + $0x10] sm:$0xff] }
 0x3eb   : > { %v1100_v59 = vpop.permute.xlu0 %1099 }
 0x3ec   : > { %v1125_v60 = vcombine.low %v1100_v59, %v1104_v58  ;;  %v1126_v61 = vcombine.high %v1100_v59, %v1104_v58 }
 0x3ee   : > { %v1133_v1 = vrot.slane %v1125_v60, %v3408_v31  ;;  %v1140_v2 = vrot.slane %v1126_v61, %v3408_v31 }
 0x3f0   : > { %v1141_v3 = vcombine.low %v1117_v62, %v1133_v1  ;;  %v1142_v4 = vcombine.high %v1117_v62, %v1133_v1  ;;  %v1157_v6 = vcombine.low %v1124_v63, %v1140_v2  ;;  %v1158_v7 = vcombine.high %v1124_v63, %v1140_v2 }
 0x3f2   : > { %v1149_v8 = vrot.slane %v1141_v3, %v3412_v38  ;;  %v1156_v9 = vrot.slane %v1142_v4, %v3412_v38  ;;  %v1165_v10 = vrot.slane %v1157_v6, %v3412_v38  ;;  %v1172_v11 = vrot.slane %v1158_v7, %v3412_v38 }
 0x3f4   : > { %v1177_v14 = vcombine.low %v1149_v8, %v1156_v9  ;;  %v2353_v15 = vcombine.high %v1149_v8, %v1156_v9  ;;  %v1193_v16 = vcombine.low %v1165_v10, %v1172_v11  ;;  %v2354_v18 = vcombine.high %v1165_v10, %v1172_v11 }
 0x3f6   : > { %v1184_v19 = vrot.slane %v1177_v14, %v3408_v31  ;;  %v1192_v20 = vrot.slane %v2353_v15, %v3408_v31  ;;  %v1200_v21 = vrot.slane %v1193_v16, %v3408_v31  ;;  %v1208_v22 = vrot.slane %v2354_v18, %v3408_v31 }
 0x3f8   : > { %v1209_v24 = vcombine.low %v1184_v19, %v1192_v20  ;;  %v1225_v25 = vcombine.low %v1200_v21, %v1208_v22  ;;  %v1210_v27 = vcombine.high %v1184_v19, %v1192_v20  ;;  %v1226_v28 = vcombine.high %v1200_v21, %v1208_v22 }
 0x3f9   : > { %v1465_v20 = vmul.f32 1.442695, %v1460_v17  ;;  %v1463_v21 = vmul.f32 1.442695, %v1459_v34  ;;  %v1467_v22 = vmul.f32 1.442695, %v1461_v52 }
 0x3fa   : > { %v1217_v29 = vrot.slane %v1209_v24, %v3412_v38  ;;  %v1233_v30 = vrot.slane %v1225_v25, %v3412_v38  ;;  %v1224_v33 = vrot.slane %v1210_v27, %v3412_v38  ;;  %v1240_v35 = vrot.slane %v1226_v28, %v3412_v38 }
 0x3fb   : > { %v1469_v24 = vmul.f32 1.442695, %v1462_v57 }
 0x3fc   : > { %v1241_v36 = vcombine.low %v1217_v29, %v1233_v30  ;;  %v1242_v37 = vcombine.high %v1217_v29, %v1233_v30  ;;  %v1243_v39 = vcombine.low %v1224_v33, %v1240_v35  ;;  %v1244_v42 = vcombine.high %v1224_v33, %v1240_v35  ;;  %v1506_v29 = vld [vmem:[#allocation4 + $0x18] sm:$0xff] }
 0x3fe   : > { %v1245_v45 = vpack.c.bf16 %v1241_v36, %v1241_v36  ;;  %v1246_v43 = vpack.c.bf16 %v1242_v37, %v1242_v37  ;;  %v1247_v48 = vpack.c.bf16 %v1243_v39, %v1243_v39  ;;  %v1248_v50 = vpack.c.bf16 %v1244_v42, %v1244_v42 }
 0x400   : > { %v1569_v53 = vsel %vm1567_vm5, %v1245_v45, 0  ;;  %v1615_v55 = vsel %vm1567_vm5, %v1246_v43, 0  ;;  %v1661_v56 = vsel %vm1567_vm5, %v1247_v48, 0  ;;  %v1707_v58 = vsel %vm1567_vm5, %v1248_v50, 0  ;;  %v1533_v43 = vld [vmem:[#allocation5 + $0x8] sm:$0xff]  ;;  %v1532_v50 = vld [vmem:[#allocation5] sm:$0xff] }
 0x401   : > { %2450 = vmatpush3.bf16.msra.mxu0 %v1569_v53  ;;  %2456 = vmatpush3.bf16.msra.mxu1 %v1615_v55 }
 0x402   : > { %2461 = vmatprep.subr.bf16.mxu0 %v2969_v0  ;;  %2467 = vmatprep.subr.bf16.mxu1 %v2969_v0 }
 0x45d   : > { %v1479_v59 = vpop.permute.xlu1 %1478  ;;  %v1474_v60 = vpop.permute.xlu0 %1473 }
 0x45e   : > { %v1492_v61 = vsub.f32 %v3496_v13, %v1479_v59  ;;  %v1491_v62 = vsub.f32 %v3494_v12, %v1474_v60 }
 0x460   : > { %v1497_v63 = vmul.f32 1.442695, %v1492_v61  ;;  %v1495_v1 = vmul.f32 1.442695, %v1491_v62 }
 0x462   : > { %2632 = vpow2.f32 %v1497_v63 }
 0x463   : > { %2634 = vpow2.f32 %v1495_v1 }
 0x465   : > { %v1484_v2 = vpop.permute.xlu1 %1483 }
 0x466   : > { %v1493_v3 = vsub.f32 %v3502_v26, %v1484_v2 }
 0x468   : > { %v1499_v4 = vmul.f32 1.442695, %v1493_v3 }
 0x469   : > { %v1489_v6 = vpop.permute.xlu0 %1488 }
 0x46a   : > { %2636 = vpow2.f32 %v1499_v4  ;;  %v1494_v7 = vsub.f32 %v3504_v32, %v1489_v6  ;;  %v1534_v6 = vld [vmem:[#allocation5 + $0x10] sm:$0xff] }
 0x46c   : > { %v2633_v8 = vpop.eup %2632  ;;  %v1501_v9 = vmul.f32 1.442695, %v1494_v7 }
 0x46d   : > { %v2635_v10 = vpop.eup %2634  ;;  %v1514_v11 = vsel %vm873_vm2, %v2633_v8, 0.0  ;;  %v1561_v13 = vpack.c.bf16 %v2633_v8, %v2633_v8 }
 0x46e   : > { %2638 = vpow2.f32 %v1501_v9  ;;  %1515 = vadd.xlane.f32.xlu0 %v1514_v11  ;;  %v1511_v12 = vsel %vm873_vm2, %v2635_v10, 0.0  ;;  %v1560_v14 = vpack.c.bf16 %v2635_v10, %v2635_v10  ;;  %v1535_v9 = vld [vmem:[#allocation5 + $0x18] sm:$0xff] }
 0x46f   : > { %1512 = vadd.xlane.f32.xlu1 %v1511_v12  ;;  %2458 = vmatmul.mubr.msk.bf16.vlgmr.msra.gmra.mrb[12].mxu1 %vm873_vm2, %v1561_v13  ;;  %2640 = vpow2.f32 %v1465_v20 }
 0x470   : > { %2452 = vmatmul.mubr.msk.bf16.vlgmr.msra.gmra.mrb[12].mxu0 %vm873_vm2, %v1560_v14  ;;  %2468 = vmatpush3.bf16.msra.mxu1 %v1707_v58  ;;  %2642 = vpow2.f32 %v1463_v21 }
 0x471   : > { %2462 = vmatpush3.bf16.msra.mxu0 %v1661_v56  ;;  %2463 = vmatprep.mubr.msk.bf16.mxu0 %vm2970_vm0, %v2969_v0  ;;  %2644 = vpow2.f32 %v1467_v22 }
 0x472   : > { %2469 = vmatprep.mubr.msk.bf16.mxu1 %vm2970_vm0, %v2969_v0  ;;  %2473 = vmatprep.subr.bf16.mxu0 %v2969_v0  ;;  %2646 = vpow2.f32 %v1469_v24 }
 0x473   : > { %2481 = vmatprep.subr.bf16.mxu1 %v2969_v0 }
 0x474   : > { %v2637_v26 = vpop.eup %2636 }
 0x475   : > { %v1517_v32 = vsel %vm873_vm2, %v2637_v26, 0.0  ;;  %v1562_v15 = vpack.c.bf16 %v2637_v26, %v2637_v26 }
 0x476   : > { %1518 = vadd.xlane.f32.xlu0 %v1517_v32 }
 0x478   : > { %v2639_v16 = vpop.eup %2638  ;;  %2464 = vmatmul.mubr.msk.bf16.vlgmr.msra.gmra.mrb[16].mxu0 %vm873_vm2, %v1562_v15 }
 0x479   : > { %v1520_v18 = vsel %vm873_vm2, %v2639_v16, 0.0  ;;  %v1563_v19 = vpack.c.bf16 %v2639_v16, %v2639_v16  ;;  %2477 = vmatprep.mubr.msk.bf16.mxu0 %vm2970_vm0, %v2969_v0  ;;  %v2641_v40 = vpop.eup %2640 }
 0x47a   : > { %1521 = vadd.xlane.f32.xlu1 %v1520_v18  ;;  %v2643_v46 = vpop.eup %2642  ;;  %v1508_v34 = vmul.f32 %v2641_v40, %v1504_v41 }
 0x47b   : > { %2470 = vmatmul.mubr.msk.bf16.vlgmr.msra.gmra.mrb[16].mxu1 %vm873_vm2, %v1563_v19  ;;  %v2645_v17 = vpop.eup %2644  ;;  %v1507_v44 = vmul.f32 %v2643_v46, %v1503_v47 }
 0x47c   : > { %2485 = vmatprep.mubr.msk.bf16.mxu1 %vm2970_vm0, %v2969_v0  ;;  %v2647_v25 = vpop.eup %2646  ;;  %v1509_v54 = vmul.f32 %v2645_v17, %v1505_v51 }
 0x47d   : > { %v1510_v36 = vmul.f32 %v2647_v25, %v1506_v29 }
 0x48b   : > { %1543 = vperm.xlu1 %2623, %v2641_v40  }
 0x48c   : > { %1538 = vperm.xlu0 %2622, %v2643_v46  }
 0x48f   : > { %1548 = vperm.xlu1 %2623, %v2645_v17  }
 0x490   : > { %1553 = vperm.xlu0 %2622, %v2647_v25  }
 0x4fb   : > { %v1516_v49 = vpop.xlane.xlu0 %1515 }
 0x4fc   : > { %v1513_v52 = vpop.xlane.xlu1 %1512  ;;  %v1524_v27 = vadd.f32 %v1516_v49, %v1508_v34 }
 0x4fd   : > { %v1523_v28 = vadd.f32 %v1513_v52, %v1507_v44 }
 0x4fe   : > { %1529 = vst.msk [vmem:[#allocation4 + $0x8] sm:$0xff] %vm864_vm4, %v1524_v27 }
 0x4ff   : > { %1528 = vst.msk [vmem:[#allocation4] sm:$0xff] %vm864_vm4, %v1523_v28 }
 0x503   : > { %v1519_v57 = vpop.xlane.xlu0 %1518 }
 0x504   : > { %v1525_v30 = vadd.f32 %v1519_v57, %v1509_v54 }
 0x505   : > { %v1769_v33 = vld [vmem:[#allocation4 + $0x8] sm:$0xff] }
 0x506   : > { %1530 = vst.msk [vmem:[#allocation4 + $0x10] sm:$0xff] %vm864_vm4, %v1525_v30  ;;  %v1768_v35 = vld [vmem:[#allocation4] sm:$0xff]  ;;  %1779 = vperm.xlu0 %2622, %v1769_v33  }
 0x507   : > { %1774 = vperm.xlu1 %2623, %v1768_v35   ;;  %v1522_v37 = vpop.xlane.xlu1 %1521 }
 0x508   : > { %v1526_v39 = vadd.f32 %v1522_v37, %v1510_v36 }
 0x50a   : > { %1531 = vst.msk [vmem:[#allocation4 + $0x18] sm:$0xff] %vm864_vm4, %v1526_v39 }
 0x50b   : > { %v1544_v48 = vpop.permute.xlu1 %1543  ;;  %v1539_v53 = vpop.permute.xlu0 %1538 }
 0x50c   : > { %v1557_v55 = vmul.f32 %v1544_v48, %v1533_v43  ;;  %v1556_v56 = vmul.f32 %v1539_v53, %v1532_v50  ;;  %v2628_v48 = vld [vmem:[#allocation14] sm:$0xff]  }
 0x50d   : > { %v1770_v42 = vld [vmem:[#allocation4 + $0x10] sm:$0xff]  ;;  %2474 = vmatpush3.bf16.msra.mxu0 %v2628_v48 }
 0x50e   : > { %1784 = vperm.xlu1 %2623, %v1770_v42   ;;  %2475 = vmatprep.subr.bf16.mxu0 %v2969_v0 }
 0x50f   : > { %v1549_v7 = vpop.permute.xlu1 %1548  ;;  %v1554_v10 = vpop.permute.xlu0 %1553 }
 0x510   : > { %v1558_v8 = vmul.f32 %v1549_v7, %v1534_v6  ;;  %v1559_v14 = vmul.f32 %v1554_v10, %v1535_v9 }
 0x511   : > { %v1771_v45 = vld [vmem:[#allocation4 + $0x18] sm:$0xff] }
 0x512   : > { %1789 = vperm.xlu0 %2622, %v1771_v45  }
 0x542   : > { %v1651_v58 = vpop.f32.mrb[12].mxu1 }
 0x543   : > { %v1605_v59 = vpop.f32.mrb[12].mxu0  ;;  %v1750_v60 = vadd.f32 %v1651_v58, %v1557_v55  ;;  %v2459_v61 = vpop.f32.mrb[13].mxu1 }
 0x544   : > { %v1749_v62 = vadd.f32 %v1605_v59, %v1556_v56  ;;  %v2453_v63 = vpop.f32.mrb[13].mxu0  ;;  %v1654_v1 = vpop.f32.mrb[14].mxu1 }
 0x545   : > { %1754 = vst.msk [vmem:[#allocation5 + $0x8] sm:$0xff] %vm873_vm2, %v1750_v60  ;;  %v1608_v2 = vpop.f32.mrb[14].mxu0  ;;  %v2460_v3 = vpop.f32.mrb[15].mxu1 }
 0x546   : > { %1753 = vst.msk [vmem:[#allocation5] sm:$0xff] %vm873_vm2, %v1749_v62  ;;  %v2454_v4 = vpop.f32.mrb[15].mxu0  ;;  %v2629_v62 = vld [vmem:[#allocation14 + $0x8] sm:$0xff]  }
 0x547   : > { %2476 = vmatpush3.bf16.msra.mxu0 %v2629_v62 }
 0x54b   : > { %v1697_v11 = vpop.f32.mrb[16].mxu0 }
 0x54c   : > { %v1751_v13 = vadd.f32 %v1697_v11, %v1558_v8  ;;  %v2465_v12 = vpop.f32.mrb[17].mxu0  ;;  %v1765_v52 = vld [vmem:[#allocation5 + $0x8] sm:$0xff] }
 0x54d   : > { %v1700_v26 = vpop.f32.mrb[18].mxu0  ;;  %v1764_v34 = vld [vmem:[#allocation5] sm:$0xff] }
 0x54e   : > { %1755 = vst.msk [vmem:[#allocation5 + $0x10] sm:$0xff] %vm873_vm2, %v1751_v13  ;;  %v2466_v32 = vpop.f32.mrb[19].mxu0  ;;  %v1743_v15 = vpop.f32.mrb[16].mxu1 }
 0x54f   : > { %v1752_v16 = vadd.f32 %v1743_v15, %v1559_v14  ;;  %v2471_v18 = vpop.f32.mrb[17].mxu1 }
 0x550   : > { %v1746_v19 = vpop.f32.mrb[18].mxu1 }
 0x551   : > { %1756 = vst.msk [vmem:[#allocation5 + $0x18] sm:$0xff] %vm873_vm2, %v1752_v16  ;;  %v2472_v20 = vpop.f32.mrb[19].mxu1 }
 0x555   : > { %v1766_v25 = vld [vmem:[#allocation5 + $0x10] sm:$0xff] }
 0x558   : > { %v1767_v27 = vld [vmem:[#allocation5 + $0x18] sm:$0xff] }
 0x585   : > { %v1780_v22 = vpop.permute.xlu0 %1779 }
 0x586   : > { %v1775_v21 = vpop.permute.xlu1 %1774 }
 0x587   : > { %2648 = vrcp.f32 %v1775_v21  ;;  %v2365_v21 = vld [vmem:[#allocation15] ss:$0 sm:$0xff] }
 0x58d   : > { %v1785_v24 = vpop.permute.xlu1 %1784 }
 0x58e   : > { %2650 = vrcp.f32 %v1785_v24 }
 0x58f   : > { %2652 = vrcp.f32 %v1780_v22 }
 0x591   : > { %v1790_v40 = vpop.permute.xlu0 %1789  ;;  %v2649_v46 = vpop.eup %2648 }
 0x592   : > { %2654 = vrcp.f32 %v1790_v40  ;;  %v1793_v44 = vmul.f32 %v2649_v46, %v1764_v34 }
 0x598   : > { %v2651_v17 = vpop.eup %2650 }
 0x599   : > { %v1797_v41 = vmul.f32 %v2651_v17, %v1766_v25  ;;  %v2653_v47 = vpop.eup %2652 }
 0x59a   : > { %v1795_v28 = vmul.f32 %v2653_v47, %v1765_v52 }
 0x59b   : > { %v1800_v51 = vcombine.low %v1793_v44, %v1797_v41  ;;  %v1801_v54 = vcombine.high %v1793_v44, %v1797_v41 }
 0x59c   : > { %v2655_v49 = vpop.eup %2654 }
 0x59d   : > { %v1799_v57 = vmul.f32 %v2655_v49, %v1767_v27  ;;  %v1808_v33 = vrot.slane %v1800_v51, %v3408_v31  ;;  %v1815_v35 = vrot.slane %v1801_v54, %v3408_v31  ;;  %v2630_v27 = vld [vmem:[%s3775_s16] sm:$0xff]  }
 0x59e   : > { %2482 = vmatpush3.bf16.msra.mxu1 %v2630_v27 }
 0x59f   : > { %v1816_v29 = vcombine.low %v1795_v28, %v1799_v57  ;;  %v1817_v30 = vcombine.high %v1795_v28, %v1799_v57  ;;  %v2631_v28 = vld [vmem:[%s3775_s16 + $0x8] sm:$0xff]   ;;  %2483 = vmatprep.subr.bf16.mxu1 %v2969_v0  ;;  %v2371_v0 = vld [vmem:[%s3777_s8] ss:$0 sm:$0xff]  ;;  %s2860_s8 = scalar_lea.vmem %s3664_s24, 128 }
 0x5a0   : > { %p2861_p3 = scmp.ne.s32.totalorder %s3664_s24, %s2860_s8  ;;  %p2868_p12 = scmp.lt.s32.totalorder %s2866_s2, %s2860_s8 }
 0x5a1   : > { %v1824_v36 = vrot.slane %v1816_v29, %v3408_v31  ;;  %v1831_v37 = vrot.slane %v1817_v30, %v3408_v31  ;;  %v2369_v29 = vld [vmem:[#allocation17] ss:$0 sm:$0xff] }
 0x5a2   : > { %2484 = vmatpush3.bf16.msra.mxu1 %v2631_v28  ;;  %p2862_p13 = pnand %p2861_p3, %p3782_p10  ;;  %p2869_p4 = por %p2868_p12, %p2867_p11 }
 0x5a3   : > { %v1832_v39 = vcombine.low %v1808_v33, %v1824_v36  ;;  %v1833_v42 = vcombine.high %v1808_v33, %v1824_v36  ;;  %v1848_v45 = vcombine.low %v1815_v35, %v1831_v37  ;;  %v1849_v43 = vcombine.high %v1815_v35, %v1831_v37  ;;  %v2370_v33 = vld [vmem:[%s3776_s15] ss:$0 sm:$0xff]  ;;  %s3781_s15 = sld [smem:[#allocation38_spill]] }
 0x5a4   : > { %p2863_p2 = pneg %p2862_p13 }
 0x5a5   : > { %v1840_v50 = vrot.slane %v1832_v39, %v3412_v38  ;;  %v1847_v53 = vrot.slane %v1833_v42, %v3412_v38  ;;  %v1856_v55 = vrot.slane %v1848_v45, %v3412_v38  ;;  %v1863_v56 = vrot.slane %v1849_v43, %v3412_v38 }
 0x5a6   : > { %p2870_p6 = pnand %p2869_p4, %p2863_p2 }
 0x5a7   : > { %v1868_v58 = vcombine.low %v1840_v50, %v1847_v53  ;;  %v2363_v59 = vcombine.high %v1840_v50, %v1847_v53  ;;  %v1884_v60 = vcombine.low %v1856_v55, %v1863_v56  ;;  %v2364_v61 = vcombine.high %v1856_v55, %v1863_v56 }
 0x5a8   : > { %v2125_v53 = vand.u32 127, %v724_v23 }
 0x5a9   : > { %v1875_v63 = vrot.slane %v1868_v58, %v3408_v31  ;;  %v1883_v1 = vrot.slane %v2363_v59, %v3408_v31  ;;  %v1891_v2 = vrot.slane %v1884_v60, %v3408_v31  ;;  %v1899_v3 = vrot.slane %v2364_v61, %v3408_v31  ;;  %s3662_s11 = scalar_lea.hbm %s3781_s15, %s2378_s21 }
 0x5aa   : > { %vm2126_vm8 = vcmp.lt.s32.totalorder %v2125_v53, 64 }
 0x5ab   : > { %v1901_v4 = vcombine.high %v1875_v63, %v1883_v1  ;;  %v1917_v6 = vcombine.high %v1891_v2, %v1899_v3  ;;  %v1900_v7 = vcombine.low %v1875_v63, %v1883_v1  ;;  %v1916_v8 = vcombine.low %v1891_v2, %v1899_v3  ;;  %v2376_v3 = vld [vmem:[%s3780_s14] ss:$0 sm:$0xff] }
 0x5ad   : > { %v1915_v9 = vrot.slane %v1901_v4, %v3412_v38  ;;  %v1931_v10 = vrot.slane %v1917_v6, %v3412_v38  ;;  %v1908_v11 = vrot.slane %v1900_v7, %v3412_v38  ;;  %v1924_v13 = vrot.slane %v1916_v8, %v3412_v38 }
 0x5af   : > { %v1934_v12 = vcombine.low %v1915_v9, %v1931_v10  ;;  %v1933_v14 = vcombine.high %v1908_v11, %v1924_v13  ;;  %v1932_v26 = vcombine.low %v1908_v11, %v1924_v13  ;;  %v1935_v31 = vcombine.high %v1915_v9, %v1931_v10 }
 0x5b1   : > { %1941 = vrot.lane.b32.xlu0 %v1934_v12, %s2979_s28  ;;  %1937 = vrot.lane.b32.xlu1 %v1933_v14, %s2980_s3  ;;  %s3779_s28 = sld [smem:[#allocation36_spill]] }
 0x5b5   : > { %1945 = vrot.lane.b32.xlu1 %v1935_v31, %s2981_s25 }
 0x5b7   : > { %v2375_v23 = vld [vmem:[%s3779_s28] ss:$0 sm:$0xff] }
 0x623   : > { %v1938_v32 = vpop.permute.xlu1 %1937  ;;  %v1942_v15 = vpop.permute.xlu0 %1941 }
 0x624   : > { %v1948_v16 = vsel %vm873_vm2, %v1932_v26, %v1938_v32 }
 0x625   : > { %v1950_v19 = vsel %vm1949_vm6, %v1948_v16, %v1942_v15 }
 0x627   : > { %v1946_v18 = vpop.permute.xlu1 %1945 }
 0x628   : > { %v1952_v20 = vsel %vm1951_vm7, %v1950_v19, %v1946_v18 }
 0x629   : > { %v1953_v38 = vpack.c.bf16 %v1952_v20, %v1952_v20 }
 0x62b   : > { %2478 = vmatmul.mubr.msk.bf16.vlgmr.msra.gmra.mrb[20].mxu0 %vm665_vm1, %v1953_v38 }
 0x6fe   : > { %v2014_v22 = vpop.f32.mrb[20].mxu0 }
 0x6ff   : > { %v2015_v24 = vadd.f32 %v2365_v21, %v2014_v22  ;;  %v2479_v40 = vpop.f32.mrb[21].mxu0 }
 0x700   : > { %v2017_v46 = vpop.f32.mrb[22].mxu0 }
 0x701   : > { %v2480_v17 = vpop.f32.mrb[23].mxu0  ;;  %v2021_v25 = vadd.f32 %v2015_v24, %v3376_v5 }
 0x703   : > { %v2022_v41 = vsel %vm665_vm1, %v2021_v25, 0.0 }
 0x704   : > { %2023 = vadd.xlane.f32.xlu0 %v2022_v41 }
 0x791   : > { %v2024_v47 = vpop.xlane.xlu0 %2023 }
 0x792   : > { %v2026_v34 = vmul.f32 0.03125, %v2024_v47 }
 0x794   : > { %v2027_v44 = vsub.f32 %v2021_v25, %v2026_v34 }
 0x796   : > { %v2028_v49 = vmul.f32 %v2027_v44, %v2027_v44 }
 0x798   : > { %v2029_v52 = vsel %vm665_vm1, %v2028_v49, 0.0 }
 0x799   : > { %2030 = vadd.xlane.f32.xlu1 %v2029_v52 }
 0x826   : > { %v2031_v5 = vpop.xlane.xlu1 %2030 }
 0x827   : > { %v2032_v51 = vmul.f32 0.03125, %v2031_v5 }
 0x829   : > { %v2033_v54 = vadd.f32 1e-05, %v2032_v51 }
 0x82b   : > { %2656 = vrsqrt.f32 %v2033_v54 }
 0x835   : > { %v2657_v57 = vpop.eup %2656 }
 0x836   : > { %v2035_v30 = vmul.f32 %v2657_v57, %v2027_v44 }
 0x838   : > { %v2043_v35 = vmul.f32 %v2369_v29, %v2035_v30 }
 0x83a   : > { %v2051_v36 = vadd.f32 %v2370_v33, %v2043_v35 }
 0x83c   : > { %v2052_v37 = vpack.c.bf16 %v2051_v36, %v2051_v36 }
 0x83e   : > { %2486 = vmatmul.mubr.msk.bf16.vlgmr.msra.gmra.mrb[20].mxu1 %vm665_vm1, %v2052_v37 }
 0x911   : > { %v2113_v39 = vpop.f32.mrb[20].mxu1 }
 0x912   : > { %v2114_v42 = vadd.f32 %v2371_v0, %v2113_v39  ;;  %v2487_v45 = vpop.f32.mrb[21].mxu1 }
 0x913   : > { %v2116_v43 = vpop.f32.mrb[22].mxu1 }
 0x914   : > { %v2119_v48 = vmax.f32 %v2114_v42, 0.0  ;;  %v2488_v50 = vpop.f32.mrb[23].mxu1 }
 0x916   : > { %2120 = vadd.xlane.f32.xlu0 %v2119_v48 }
 0x9a3   : > { %v2121_v55 = vpop.xlane.xlu0 %2120 }
 0x9a4   : > { %v2122_v56 = vmul.f32 0.015625, %v2121_v55 }
 0x9a6   : > { %v2123_v58 = vsub.f32 %v2119_v48, %v2122_v56 }
 0x9a8   : > { %v2129_v59 = vsel %vm2126_vm8, %v2123_v58, 0.0 }
 0x9a9   : > { %v2130_v60 = vmul.f32 %v2129_v59, %v2129_v59 }
 0x9ab   : > { %2131 = vadd.xlane.f32.xlu0 %v2130_v60 }
 0xa38   : > { %v2132_v61 = vpop.xlane.xlu0 %2131 }
 0xa39   : > { %v2133_v62 = vmul.f32 0.015625, %v2132_v61 }
 0xa3b   : > { %v2134_v63 = vadd.f32 1e-05, %v2133_v62 }
 0xa3d   : > { %2658 = vrsqrt.f32 %v2134_v63 }
 0xa47   : > { %v2659_v1 = vpop.eup %2658 }
 0xa48   : > { %v2136_v2 = vmul.f32 %v2659_v1, %v2129_v59 }
 0xa4a   : > { %v2144_v4 = vmul.f32 %v2375_v23, %v2136_v2 }
 0xa4c   : > { %v2152_v6 = vadd.f32 %v2376_v3, %v2144_v4 }
 0xa4e   : > { %2153 = vst [vmem:[%s634_s10] sm:$0xff] %v2152_v6 }
 0xa4f   : > { %2873 = shalt.err (!%p2870_p6)
}
 0xa50   : > { %s2874_s12 = scalar_lea.hbm %s3662_s11, 128  ;;  %s2878_s3 = scalar_lea.hbm %s3781_s15, 256 }
 0xa51   : > { %p2875_p5 = scmp.ne.s32.totalorder %s3662_s11, %s2874_s12  ;;  %p2879_p8 = scmp.lt.u32.totalorder %s3662_s11, %s3781_s15 }
 0xa52   : > { %p2880_p9 = scmp.lt.u32.totalorder %s2878_s3, %s2874_s12  ;;  %p2882_p3 = scmp.lt.u32.totalorder %s2874_s12, %s3662_s11 }
 0xa53   : > { %p2876_p7 = pnand %p2875_p5, %p3782_p10 }
 0xa54   : > { %p2881_p1 = por %p2880_p9, %p2879_p8 }
 0xa55   : > { %p2877_p0 = pneg %p2876_p7 }
 0xa56   : > { %p2883_p13 = por %p2882_p3, %p2881_p1 }
 0xa58   : > { %p2884_p2 = pnand %p2883_p13, %p2877_p0 }
 0xa5a   : > { %2887 = shalt.err (!%p2884_p2)
}
 0xa5b   : > { %2513 = dma.vmem_to_hbm [thread:$0]  (%p3782_p10), %s3664_s24, 128, %s3662_s11, %s2155_s22  }
 0xa5c PF: > { %s2180_s21 = sand.u32 1, %s2938_s18   ;;  %p3783_p11 = scmp.ne.s32.totalorder %s3765_s29, 0 }
 0xa5d   : > { %p3784_p12 = scmp.ge.s32.totalorder %s2958_s23, 2  ;;  %s2181_s10 = scalar_lea.sflag [#allocation8], %s2180_s21 }
 0xa5f   : > { %p2539_p4 = pnand %p3784_p12, %p3783_p11 }
 0xa61   : > { %2933 = dma.done.wait (!%p2539_p4), %s2181_s10, 128  }
 0xa62   : > { %2935 = vsyncadd (!%p2539_p4), %s2181_s10, 4294967168  ;;  %s36_s23 = sadd.s32 1, %s2958_s23   ;;  %s3785_s21 = sld [smem:[#allocation26_spill]] }
 0xa63   : > { %p33_p6 = scmp.ge.s32.totalorder %s36_s23, 4   ;;  %s3786_s22 = sld [smem:[#allocation27_spill]] }
 0xa64   : > { %s3787_s18 = smov %s2942_s19  ;;  %s3788_s19 = smov %s2946_s20 }
 0xa65   : > { %s3789_s20 = smov %s3253_s13  ;;  %35 = sbr.rel (!%p33_p6) target bundleno = 22 (0x16), region = 167 }
 0xa6c   :  { %2186 = vsyncpa [#allocation7], 1 }
 0xa6d   :  { %2188 = vsyncpa [#allocation7 + $0x1], 1 }
 0xa6e   :  { %2189 = vsyncpa [#allocation10], 1 }
 0xa6f   :  { %2191 = vsyncpa [#allocation10 + $0x1], 1 }
 0xa70   :  { %2192 = vsyncpa [#allocation13], 1 }
 0xa71   :  { %2193 = vsyncpa [#allocation16], 1 }
 0xa72   :  { %2194 = vsyncpa [#allocation8], 1 }
 0xa73   :  { %2196 = vsyncpa [#allocation8 + $0x1], 1 }

</bundles_post_ra>
